<compile_context>
chip_gen: v6e
topology: v6e:2x2x1
jax: 0.10.0
libtpu: 0.0.40
codegen_flags: <defaults>
</compile_context>

<pallas_src>
import functools

import jax
import jax.numpy as jnp
from jax import lax
from jax.experimental import pallas as pl
from jax.experimental.pallas import tpu as pltpu


def _round_up(x, m):
    return ((x + m - 1) // m) * m


def _pad_to(x, shape):
    pads = [(0, s - d) for d, s in zip(x.shape, shape)]
    return jnp.pad(x, pads)


def _make_rnn_kernel(num_layers, tile_t, tile_b, h_pad, out_dim):
    """Kernel closure for static layer count / tile sizes."""
    m = tile_t * tile_b
    unroll = min(tile_t, 8)  # don't fully unroll long time tiles

    def kernel(x_ref, *rest):
        # rest = [w_ih_T_0, w_hh_T_0, bias_0, ..., w_fc_T, b_fc,
        #         out_ref, h_ref, hs_ref]
        w_refs = rest[: 3 * num_layers]
        w_fc_ref, b_fc_ref, out_ref, h_ref, hs_ref = rest[3 * num_layers:]

        # Zero hidden state at the start of each batch-block's time sweep
        # (PyTorch nn.RNN default h0 = zeros).
        @pl.when(pl.program_id(1) == 0)
        def _():
            h_ref[...] = jnp.zeros_like(h_ref)

        d_in = x_ref.shape[-1]
        layer_in = x_ref[...].reshape(m, d_in)

        for l in range(num_layers):
            # Hoisted weight/bias reads (once per layer per block, not per
            # unrolled timestep).
            w_ih = w_refs[3 * l][...]         # (K, H_pad)
            w_hh = w_refs[3 * l + 1][...]     # (H_pad, H_pad)
            bias = w_refs[3 * l + 2][...]     # (1, H_pad), b_ih + b_hh fused

            # One big MXU matmul for the whole time tile: input projection
            # (+ bias), hoisted off the serial recurrence chain.
            proj = (
                jnp.dot(layer_in, w_ih, preferred_element_type=jnp.float32)
                + bias
            )
            hs_ref[...] = proj.reshape(tile_t, tile_b, h_pad)

            # Serial recurrence: only h @ W_hh + tanh remains per step.
            def step(t, h, w_hh=w_hh):
                h_new = jnp.tanh(
                    hs_ref[t]
                    + jnp.dot(h, w_hh, preferred_element_type=jnp.float32)
                )
                hs_ref[t] = h_new            # reuse hs as this layer's output
                return h_new

            h_last = lax.fori_loop(0, tile_t, step, h_ref[l], unroll=unroll)
            h_ref[l] = h_last
            layer_in = hs_ref[...].reshape(m, h_pad)

        # Batched FC head over the whole time tile: one (M, H) @ (H, O).
        out = (
            jnp.dot(layer_in, w_fc_ref[...], preferred_element_type=jnp.float32)
            + b_fc_ref[...]
        )
        out_ref[...] = out.reshape(tile_t, tile_b, out_dim).astype(out_ref.dtype)

    return kernel


def init_rnn_params(key, input_dim, hidden_dim, num_layers, output_dim):
    """Deterministic parameter init (shapes match nn.RNN + nn.Linear)."""
    params = {}
    bound = 1.0 / jnp.sqrt(hidden_dim)
    keys = jax.random.split(key, 4 * num_layers + 2)
    k = 0
    for l in range(num_layers):
        in_dim = input_dim if l == 0 else hidden_dim
        params[f"w_ih_{l}"] = jax.random.uniform(
            keys[k], (hidden_dim, in_dim), jnp.float32, -bound, bound); k += 1
        params[f"w_hh_{l}"] = jax.random.uniform(
            keys[k], (hidden_dim, hidden_dim), jnp.float32, -bound, bound); k += 1
        params[f"b_ih_{l}"] = jax.random.uniform(
            keys[k], (hidden_dim,), jnp.float32, -bound, bound); k += 1
        params[f"b_hh_{l}"] = jax.random.uniform(
            keys[k], (hidden_dim,), jnp.float32, -bound, bound); k += 1
    params["w_fc"] = jax.random.uniform(
        keys[k], (output_dim, hidden_dim), jnp.float32, -bound, bound); k += 1
    params["b_fc"] = jax.random.uniform(
        keys[k], (output_dim,), jnp.float32, -bound, bound); k += 1
    return params


@functools.partial(jax.jit, static_argnames=("num_layers",))
def rnn_forward(inputs, params, *, num_layers):
    """inputs: (B, T, D_in) batch_first. Returns (B, D_out, T)."""
    B, T, D_in = inputs.shape
    H = params["w_hh_0"].shape[0]
    O = params["w_fc"].shape[0]
    H_pad = _round_up(H, 128)

    # ---- tile selection --------------------------------------------------
    B_pad = _round_up(B, 8)
    if B_pad >= 16:
        # >=2 batch blocks so the "parallel" axis can feed both v7x TCs.
        tile_b = max(8, min(64, _round_up(B_pad // 2, 8)))
    else:
        tile_b = B_pad

    if T <= 128:
        tile_t = T                                  # no T padding
    else:
        cands = (128, 112, 96, 80, 64, 48, 32)      # minimize T_pad - T
        tile_t = min(cands, key=lambda c: (_round_up(T, c) - T, -c))

    def vmem_estimate(tt, tb):
        m = tt * tb
        total = 0
        total += 2 * tt * tb * D_in * 4             # x block, double buffered
        total += 2 * tt * tb * O * 4                # out block, double buffered
        total += m * H_pad * 4                      # hs scratch
        total += num_layers * tb * H_pad * 4        # h scratch
        w = 0
        for l in range(num_layers):
            in_p = D_in if l == 0 else H_pad
            w += (in_p * H_pad + H_pad * H_pad + H_pad) * 4
        w += (H_pad * O + O) * 4
        total += 2 * w                              # weights (double buffered)
        total += 3 * m * H_pad * 4                  # large value temporaries
        return total

    budget = 48 * 1024 * 1024   # fits v7x's 64 MiB physical VMEM w/ headroom
    while tile_t > 8 and vmem_estimate(tile_t, tile_b) > budget:
        tile_t = max(8, tile_t // 2)
    while tile_b > 8 and vmem_estimate(tile_t, tile_b) > budget:
        tile_b = max(8, _round_up(tile_b // 2, 8))

    T_pad = _round_up(T, tile_t)
    B_pad = _round_up(B_pad, tile_b)

    # ---- operand prep ------------------------------------------------------
    # Time-major input, batch padded to sublanes only; D_in stays unpadded
    # (block last dim == full array dim, legal per the (8,128) rule).
    x_tm = jnp.transpose(inputs, (1, 0, 2)).astype(jnp.float32)   # (T, B, D)
    x_tm = _pad_to(x_tm, (T_pad, B_pad, D_in))

    # Pre-transposed weights, fused RNN biases.
    weight_args, weight_specs = [], []
    for l in range(num_layers):
        in_pad = D_in if l == 0 else H_pad
        w_ih_t = _pad_to(params[f"w_ih_{l}"].astype(jnp.float32).T,
                         (in_pad, H_pad))
        w_hh_t = _pad_to(params[f"w_hh_{l}"].astype(jnp.float32).T,
                         (H_pad, H_pad))
        bias = _pad_to(
            (params[f"b_ih_{l}"] + params[f"b_hh_{l}"])
            .astype(jnp.float32).reshape(1, H),
            (1, H_pad),
        )
        weight_args += [w_ih_t, w_hh_t, bias]
        weight_specs += [
            pl.BlockSpec(w_ih_t.shape, lambda b, t: (0, 0)),
            pl.BlockSpec(w_hh_t.shape, lambda b, t: (0, 0)),
            pl.BlockSpec(bias.shape, lambda b, t: (0, 0)),
        ]
    # FC head weights: O stays unpadded (no 32x lane padding on the output).
    w_fc_t = _pad_to(params["w_fc"].astype(jnp.float32).T, (H_pad, O))
    b_fc = params["b_fc"].astype(jnp.float32).reshape(1, O)
    weight_args += [w_fc_t, b_fc]
    weight_specs += [
        pl.BlockSpec(w_fc_t.shape, lambda b, t: (0, 0)),
        pl.BlockSpec(b_fc.shape, lambda b, t: (0, 0)),
    ]

    kernel = _make_rnn_kernel(num_layers, tile_t, tile_b, H_pad, O)

    est = vmem_estimate(tile_t, tile_b)
    vmem_limit = int(min(max(2 * est, 32 * 1024 * 1024), 64 * 1024 * 1024))

    out_tm = pl.pallas_call(
        kernel,
        out_shape=jax.ShapeDtypeStruct((T_pad, B_pad, O), jnp.float32),
        grid_spec=pltpu.PrefetchScalarGridSpec(
            num_scalar_prefetch=0,
            # batch blocks parallel (megacore), time blocks sequential.
            grid=(B_pad // tile_b, T_pad // tile_t),
            in_specs=[
                pl.BlockSpec((tile_t, tile_b, D_in), lambda b, t: (t, b, 0))
            ] + weight_specs,
            out_specs=pl.BlockSpec((tile_t, tile_b, O),
                                   lambda b, t: (t, b, 0)),
            scratch_shapes=[
                pltpu.VMEM((num_layers, tile_b, H_pad), jnp.float32),  # h
                pltpu.VMEM((tile_t, tile_b, H_pad), jnp.float32),      # hs
            ],
        ),
        compiler_params=pltpu.CompilerParams(
            dimension_semantics=("parallel", "arbitrary"),
            vmem_limit_bytes=vmem_limit,
        ),
    )(x_tm, *weight_args)

    # Slice off padding; (T, B, O) -> (B, O, T)  (== outputs.transpose(1, 2)).
    out = out_tm[:T, :B, :]
    return jnp.transpose(out, (1, 2, 0))


def rnn_forward_ref(inputs, params, num_layers):
    """Pure-JAX reference for correctness checking."""
    B, T, _ = inputs.shape
    H = params["w_hh_0"].shape[0]
    layer_in = inputs.astype(jnp.float32)
    for l in range(num_layers):
        w_ih = params[f"w_ih_{l}"]
        w_hh = params[f"w_hh_{l}"]
        b_ih = params[f"b_ih_{l}"]
        b_hh = params[f"b_hh_{l}"]
        h = jnp.zeros((B, H), jnp.float32)
        outs = []
        for t in range(T):
            h = jnp.tanh(layer_in[:, t] @ w_ih.T + b_ih + h @ w_hh.T + b_hh)
            outs.append(h)
        layer_in = jnp.stack(outs, axis=1)
    out = layer_in @ params["w_fc"].T + params["b_fc"]  # (B, T, O)
    return jnp.transpose(out, (0, 2, 1))                 # (B, O, T)


if __name__ == "__main__":
    input_dim = 4
    hidden_dim = 32
    num_layers = 2
    output_dim = 4
    B, T = 2, 8

    key = jax.random.PRNGKey(0)
    k_x, k_p = jax.random.split(key)
    x = jax.random.normal(k_x, (B, T, input_dim), jnp.float32)
    params = init_rnn_params(k_p, input_dim, hidden_dim, num_layers, output_dim)

    out = rnn_forward(x, params, num_layers=num_layers)
    out = jax.block_until_ready(out)

    ref = rnn_forward_ref(x, params, num_layers)
    assert out.shape == (B, output_dim, T), out.shape
    assert jnp.allclose(out, ref, atol=1e-5, rtol=1e-5), "mismatch vs reference"

    print("KERNEL_OK")
</pallas_src>

<mosaic_0001>
module attributes {stable_mosaic.version = 11 : i64} {
  func.func @kernel(%arg0: i32, %arg1: i32, %arg2: memref<8x8x4xf32, #tpu.memory_space<vmem>>, %arg3: memref<4x128xf32, #tpu.memory_space<vmem>>, %arg4: memref<128x128xf32, #tpu.memory_space<vmem>>, %arg5: memref<1x128xf32, #tpu.memory_space<vmem>>, %arg6: memref<128x128xf32, #tpu.memory_space<vmem>>, %arg7: memref<128x128xf32, #tpu.memory_space<vmem>>, %arg8: memref<1x128xf32, #tpu.memory_space<vmem>>, %arg9: memref<128x4xf32, #tpu.memory_space<vmem>>, %arg10: memref<1x4xf32, #tpu.memory_space<vmem>>, %arg11: memref<8x8x4xf32, #tpu.memory_space<vmem>>, %arg12: memref<2x8x128xf32, #tpu.memory_space<vmem>>, %arg13: memref<8x8x128xf32, #tpu.memory_space<vmem>>) attributes {dimension_semantics = [#tpu.dimension_semantics<parallel>, #tpu.dimension_semantics<arbitrary>], iteration_bounds = array<i64: 1, 1>, scalar_prefetch = 0 : i64, scratch_operands = 2 : i64, tpu.core_type = #tpu.core_type<tc>, window_params = [{transform_indices = @transform_0, window_bounds = array<i64: 8, 8, 4>}, {pipeline_mode = #tpu.pipeline_mode<synchronous>, transform_indices = @transform_1, window_bounds = array<i64: 4, 128>}, {pipeline_mode = #tpu.pipeline_mode<synchronous>, transform_indices = @transform_2, window_bounds = array<i64: 128, 128>}, {pipeline_mode = #tpu.pipeline_mode<synchronous>, transform_indices = @transform_3, window_bounds = array<i64: 1, 128>}, {pipeline_mode = #tpu.pipeline_mode<synchronous>, transform_indices = @transform_4, window_bounds = array<i64: 128, 128>}, {pipeline_mode = #tpu.pipeline_mode<synchronous>, transform_indices = @transform_5, window_bounds = array<i64: 128, 128>}, {pipeline_mode = #tpu.pipeline_mode<synchronous>, transform_indices = @transform_6, window_bounds = array<i64: 1, 128>}, {pipeline_mode = #tpu.pipeline_mode<synchronous>, transform_indices = @transform_7, window_bounds = array<i64: 128, 4>}, {pipeline_mode = #tpu.pipeline_mode<synchronous>, transform_indices = @transform_8, window_bounds = array<i64: 1, 4>}, {transform_indices = @transform_9, window_bounds = array<i64: 8, 8, 4>}]} {
    %c0_i32 = arith.constant 0 : i32
    %0 = arith.cmpi eq, %arg1, %c0_i32 : i32
    %1 = arith.extui %0 : i1 to i32
    %c0_i32_0 = arith.constant 0 : i32
    %2 = arith.cmpi ne, %1, %c0_i32_0 : i32
    scf.if %2 {
      %cst_137 = arith.constant 0.000000e+00 : f32
      %202 = vector.broadcast %cst_137 : f32 to vector<2x8x128xf32>
      %c0_138 = arith.constant 0 : index
      %c0_139 = arith.constant 0 : index
      %c0_140 = arith.constant 0 : index
      %203 = vector.load %arg12[%c0_138, %c0_139, %c0_140] : memref<2x8x128xf32, #tpu.memory_space<vmem>>, vector<2x8x128xf32>
      tpu.vector_store %arg12[%c0_138, %c0_139, %c0_140], %202 {strides = array<i32>} : memref<2x8x128xf32, #tpu.memory_space<vmem>>, vector<2x8x128xf32>,
    } else {
    }
    %c0 = arith.constant 0 : index
    %c0_1 = arith.constant 0 : index
    %c0_2 = arith.constant 0 : index
    %3 = vector.load %arg2[%c0, %c0_1, %c0_2] : memref<8x8x4xf32, #tpu.memory_space<vmem>>, vector<8x8x4xf32>
    %4 = vector.shape_cast %3 : vector<8x8x4xf32> to vector<64x4xf32>
    %c0_3 = arith.constant 0 : index
    %c0_4 = arith.constant 0 : index
    %5 = vector.load %arg3[%c0_3, %c0_4] : memref<4x128xf32, #tpu.memory_space<vmem>>, vector<4x128xf32>
    %c0_5 = arith.constant 0 : index
    %c0_6 = arith.constant 0 : index
    %6 = vector.load %arg4[%c0_5, %c0_6] : memref<128x128xf32, #tpu.memory_space<vmem>>, vector<128x128xf32>
    %c0_7 = arith.constant 0 : index
    %c0_8 = arith.constant 0 : index
    %7 = vector.load %arg5[%c0_7, %c0_8] : memref<1x128xf32, #tpu.memory_space<vmem>>, vector<1x128xf32>
    %cst = arith.constant dense<0.000000e+00> : vector<64x128xf32>
    %8 = tpu.matmul %4, %5, %cst {dimension_numbers = #tpu.dot_dimension_numbers<[1], [0], [0], [1], [0, 0, 1, 1], [], []>} : vector<64x4xf32>, vector<4x128xf32>, vector<64x128xf32> -> vector<64x128xf32>
    %9 = vector.broadcast %7 : vector<1x128xf32> to vector<64x128xf32>
    %10 = arith.addf %8, %9 : vector<64x128xf32>
    %11 = vector.shape_cast %10 : vector<64x128xf32> to vector<8x8x128xf32>
    %c0_9 = arith.constant 0 : index
    %c0_10 = arith.constant 0 : index
    %c0_11 = arith.constant 0 : index
    %12 = vector.load %arg13[%c0_9, %c0_10, %c0_11] : memref<8x8x128xf32, #tpu.memory_space<vmem>>, vector<8x8x128xf32>
    tpu.vector_store %arg13[%c0_9, %c0_10, %c0_11], %11 {strides = array<i32>} : memref<8x8x128xf32, #tpu.memory_space<vmem>>, vector<8x8x128xf32>,
    %c0_12 = arith.constant 0 : index
    %c0_13 = arith.constant 0 : index
    %c0_14 = arith.constant 0 : index
    %13 = vector.load %arg12[%c0_12, %c0_13, %c0_14] : memref<2x8x128xf32, #tpu.memory_space<vmem>>, vector<1x8x128xf32>
    %14 = vector.shape_cast %13 : vector<1x8x128xf32> to vector<8x128xf32>
    %c0_i32_15 = arith.constant 0 : i32
    %15 = arith.index_cast %c0_i32_15 : i32 to index
    %c0_16 = arith.constant 0 : index
    %c0_17 = arith.constant 0 : index
    %16 = vector.load %arg13[%15, %c0_16, %c0_17] : memref<8x8x128xf32, #tpu.memory_space<vmem>>, vector<1x8x128xf32>
    %17 = vector.shape_cast %16 : vector<1x8x128xf32> to vector<8x128xf32>
    %cst_18 = arith.constant dense<0.000000e+00> : vector<8x128xf32>
    %18 = tpu.matmul %14, %6, %cst_18 {dimension_numbers = #tpu.dot_dimension_numbers<[1], [0], [0], [1], [0, 0, 1, 1], [], []>} : vector<8x128xf32>, vector<128x128xf32>, vector<8x128xf32> -> vector<8x128xf32>
    %19 = arith.addf %17, %18 : vector<8x128xf32>
    %20 = math.tanh %19 : vector<8x128xf32>
    %21 = arith.index_cast %c0_i32_15 : i32 to index
    %c0_19 = arith.constant 0 : index
    %c0_20 = arith.constant 0 : index
    %22 = vector.load %arg13[%21, %c0_19, %c0_20] : memref<8x8x128xf32, #tpu.memory_space<vmem>>, vector<1x8x128xf32>
    %23 = vector.shape_cast %22 : vector<1x8x128xf32> to vector<8x128xf32>
    %24 = vector.shape_cast %20 : vector<8x128xf32> to vector<1x8x128xf32>
    tpu.vector_store %arg13[%21, %c0_19, %c0_20], %24 {strides = array<i32>} : memref<8x8x128xf32, #tpu.memory_space<vmem>>, vector<1x8x128xf32>,
    %c1_i32 = arith.constant 1 : i32
    %25 = arith.index_cast %c1_i32 : i32 to index
    %c0_21 = arith.constant 0 : index
    %c0_22 = arith.constant 0 : index
    %26 = vector.load %arg13[%25, %c0_21, %c0_22] : memref<8x8x128xf32, #tpu.memory_space<vmem>>, vector<1x8x128xf32>
    %27 = vector.shape_cast %26 : vector<1x8x128xf32> to vector<8x128xf32>
    %cst_23 = arith.constant dense<0.000000e+00> : vector<8x128xf32>
    %28 = tpu.matmul %20, %6, %cst_23 {dimension_numbers = #tpu.dot_dimension_numbers<[1], [0], [0], [1], [0, 0, 1, 1], [], []>} : vector<8x128xf32>, vector<128x128xf32>, vector<8x128xf32> -> vector<8x128xf32>
    %29 = arith.addf %27, %28 : vector<8x128xf32>
    %30 = math.tanh %29 : vector<8x128xf32>
    %31 = arith.index_cast %c1_i32 : i32 to index
    %c0_24 = arith.constant 0 : index
    %c0_25 = arith.constant 0 : index
    %32 = vector.load %arg13[%31, %c0_24, %c0_25] : memref<8x8x128xf32, #tpu.memory_space<vmem>>, vector<1x8x128xf32>
    %33 = vector.shape_cast %32 : vector<1x8x128xf32> to vector<8x128xf32>
    %34 = vector.shape_cast %30 : vector<8x128xf32> to vector<1x8x128xf32>
    tpu.vector_store %arg13[%31, %c0_24, %c0_25], %34 {strides = array<i32>} : memref<8x8x128xf32, #tpu.memory_space<vmem>>, vector<1x8x128xf32>,
    %c2_i32 = arith.constant 2 : i32
    %35 = arith.index_cast %c2_i32 : i32 to index
    %c0_26 = arith.constant 0 : index
    %c0_27 = arith.constant 0 : index
    %36 = vector.load %arg13[%35, %c0_26, %c0_27] : memref<8x8x128xf32, #tpu.memory_space<vmem>>, vector<1x8x128xf32>
    %37 = vector.shape_cast %36 : vector<1x8x128xf32> to vector<8x128xf32>
    %cst_28 = arith.constant dense<0.000000e+00> : vector<8x128xf32>
    %38 = tpu.matmul %30, %6, %cst_28 {dimension_numbers = #tpu.dot_dimension_numbers<[1], [0], [0], [1], [0, 0, 1, 1], [], []>} : vector<8x128xf32>, vector<128x128xf32>, vector<8x128xf32> -> vector<8x128xf32>
    %39 = arith.addf %37, %38 : vector<8x128xf32>
    %40 = math.tanh %39 : vector<8x128xf32>
    %41 = arith.index_cast %c2_i32 : i32 to index
    %c0_29 = arith.constant 0 : index
    %c0_30 = arith.constant 0 : index
    %42 = vector.load %arg13[%41, %c0_29, %c0_30] : memref<8x8x128xf32, #tpu.memory_space<vmem>>, vector<1x8x128xf32>
    %43 = vector.shape_cast %42 : vector<1x8x128xf32> to vector<8x128xf32>
    %44 = vector.shape_cast %40 : vector<8x128xf32> to vector<1x8x128xf32>
    tpu.vector_store %arg13[%41, %c0_29, %c0_30], %44 {strides = array<i32>} : memref<8x8x128xf32, #tpu.memory_space<vmem>>, vector<1x8x128xf32>,
    %c3_i32 = arith.constant 3 : i32
    %45 = arith.index_cast %c3_i32 : i32 to index
    %c0_31 = arith.constant 0 : index
    %c0_32 = arith.constant 0 : index
    %46 = vector.load %arg13[%45, %c0_31, %c0_32] : memref<8x8x128xf32, #tpu.memory_space<vmem>>, vector<1x8x128xf32>
    %47 = vector.shape_cast %46 : vector<1x8x128xf32> to vector<8x128xf32>
    %cst_33 = arith.constant dense<0.000000e+00> : vector<8x128xf32>
    %48 = tpu.matmul %40, %6, %cst_33 {dimension_numbers = #tpu.dot_dimension_numbers<[1], [0], [0], [1], [0, 0, 1, 1], [], []>} : vector<8x128xf32>, vector<128x128xf32>, vector<8x128xf32> -> vector<8x128xf32>
    %49 = arith.addf %47, %48 : vector<8x128xf32>
    %50 = math.tanh %49 : vector<8x128xf32>
    %51 = arith.index_cast %c3_i32 : i32 to index
    %c0_34 = arith.constant 0 : index
    %c0_35 = arith.constant 0 : index
    %52 = vector.load %arg13[%51, %c0_34, %c0_35] : memref<8x8x128xf32, #tpu.memory_space<vmem>>, vector<1x8x128xf32>
    %53 = vector.shape_cast %52 : vector<1x8x128xf32> to vector<8x128xf32>
    %54 = vector.shape_cast %50 : vector<8x128xf32> to vector<1x8x128xf32>
    tpu.vector_store %arg13[%51, %c0_34, %c0_35], %54 {strides = array<i32>} : memref<8x8x128xf32, #tpu.memory_space<vmem>>, vector<1x8x128xf32>,
    %c4_i32 = arith.constant 4 : i32
    %55 = arith.index_cast %c4_i32 : i32 to index
    %c0_36 = arith.constant 0 : index
    %c0_37 = arith.constant 0 : index
    %56 = vector.load %arg13[%55, %c0_36, %c0_37] : memref<8x8x128xf32, #tpu.memory_space<vmem>>, vector<1x8x128xf32>
    %57 = vector.shape_cast %56 : vector<1x8x128xf32> to vector<8x128xf32>
    %cst_38 = arith.constant dense<0.000000e+00> : vector<8x128xf32>
    %58 = tpu.matmul %50, %6, %cst_38 {dimension_numbers = #tpu.dot_dimension_numbers<[1], [0], [0], [1], [0, 0, 1, 1], [], []>} : vector<8x128xf32>, vector<128x128xf32>, vector<8x128xf32> -> vector<8x128xf32>
    %59 = arith.addf %57, %58 : vector<8x128xf32>
    %60 = math.tanh %59 : vector<8x128xf32>
    %61 = arith.index_cast %c4_i32 : i32 to index
    %c0_39 = arith.constant 0 : index
    %c0_40 = arith.constant 0 : index
    %62 = vector.load %arg13[%61, %c0_39, %c0_40] : memref<8x8x128xf32, #tpu.memory_space<vmem>>, vector<1x8x128xf32>
    %63 = vector.shape_cast %62 : vector<1x8x128xf32> to vector<8x128xf32>
    %64 = vector.shape_cast %60 : vector<8x128xf32> to vector<1x8x128xf32>
    tpu.vector_store %arg13[%61, %c0_39, %c0_40], %64 {strides = array<i32>} : memref<8x8x128xf32, #tpu.memory_space<vmem>>, vector<1x8x128xf32>,
    %c5_i32 = arith.constant 5 : i32
    %65 = arith.index_cast %c5_i32 : i32 to index
    %c0_41 = arith.constant 0 : index
    %c0_42 = arith.constant 0 : index
    %66 = vector.load %arg13[%65, %c0_41, %c0_42] : memref<8x8x128xf32, #tpu.memory_space<vmem>>, vector<1x8x128xf32>
    %67 = vector.shape_cast %66 : vector<1x8x128xf32> to vector<8x128xf32>
    %cst_43 = arith.constant dense<0.000000e+00> : vector<8x128xf32>
    %68 = tpu.matmul %60, %6, %cst_43 {dimension_numbers = #tpu.dot_dimension_numbers<[1], [0], [0], [1], [0, 0, 1, 1], [], []>} : vector<8x128xf32>, vector<128x128xf32>, vector<8x128xf32> -> vector<8x128xf32>
    %69 = arith.addf %67, %68 : vector<8x128xf32>
    %70 = math.tanh %69 : vector<8x128xf32>
    %71 = arith.index_cast %c5_i32 : i32 to index
    %c0_44 = arith.constant 0 : index
    %c0_45 = arith.constant 0 : index
    %72 = vector.load %arg13[%71, %c0_44, %c0_45] : memref<8x8x128xf32, #tpu.memory_space<vmem>>, vector<1x8x128xf32>
    %73 = vector.shape_cast %72 : vector<1x8x128xf32> to vector<8x128xf32>
    %74 = vector.shape_cast %70 : vector<8x128xf32> to vector<1x8x128xf32>
    tpu.vector_store %arg13[%71, %c0_44, %c0_45], %74 {strides = array<i32>} : memref<8x8x128xf32, #tpu.memory_space<vmem>>, vector<1x8x128xf32>,
    %c6_i32 = arith.constant 6 : i32
    %75 = arith.index_cast %c6_i32 : i32 to index
    %c0_46 = arith.constant 0 : index
    %c0_47 = arith.constant 0 : index
    %76 = vector.load %arg13[%75, %c0_46, %c0_47] : memref<8x8x128xf32, #tpu.memory_space<vmem>>, vector<1x8x128xf32>
    %77 = vector.shape_cast %76 : vector<1x8x128xf32> to vector<8x128xf32>
    %cst_48 = arith.constant dense<0.000000e+00> : vector<8x128xf32>
    %78 = tpu.matmul %70, %6, %cst_48 {dimension_numbers = #tpu.dot_dimension_numbers<[1], [0], [0], [1], [0, 0, 1, 1], [], []>} : vector<8x128xf32>, vector<128x128xf32>, vector<8x128xf32> -> vector<8x128xf32>
    %79 = arith.addf %77, %78 : vector<8x128xf32>
    %80 = math.tanh %79 : vector<8x128xf32>
    %81 = arith.index_cast %c6_i32 : i32 to index
    %c0_49 = arith.constant 0 : index
    %c0_50 = arith.constant 0 : index
    %82 = vector.load %arg13[%81, %c0_49, %c0_50] : memref<8x8x128xf32, #tpu.memory_space<vmem>>, vector<1x8x128xf32>
    %83 = vector.shape_cast %82 : vector<1x8x128xf32> to vector<8x128xf32>
    %84 = vector.shape_cast %80 : vector<8x128xf32> to vector<1x8x128xf32>
    tpu.vector_store %arg13[%81, %c0_49, %c0_50], %84 {strides = array<i32>} : memref<8x8x128xf32, #tpu.memory_space<vmem>>, vector<1x8x128xf32>,
    %c7_i32 = arith.constant 7 : i32
    %85 = arith.index_cast %c7_i32 : i32 to index
    %c0_51 = arith.constant 0 : index
    %c0_52 = arith.constant 0 : index
    %86 = vector.load %arg13[%85, %c0_51, %c0_52] : memref<8x8x128xf32, #tpu.memory_space<vmem>>, vector<1x8x128xf32>
    %87 = vector.shape_cast %86 : vector<1x8x128xf32> to vector<8x128xf32>
    %cst_53 = arith.constant dense<0.000000e+00> : vector<8x128xf32>
    %88 = tpu.matmul %80, %6, %cst_53 {dimension_numbers = #tpu.dot_dimension_numbers<[1], [0], [0], [1], [0, 0, 1, 1], [], []>} : vector<8x128xf32>, vector<128x128xf32>, vector<8x128xf32> -> vector<8x128xf32>
    %89 = arith.addf %87, %88 : vector<8x128xf32>
    %90 = math.tanh %89 : vector<8x128xf32>
    %91 = arith.index_cast %c7_i32 : i32 to index
    %c0_54 = arith.constant 0 : index
    %c0_55 = arith.constant 0 : index
    %92 = vector.load %arg13[%91, %c0_54, %c0_55] : memref<8x8x128xf32, #tpu.memory_space<vmem>>, vector<1x8x128xf32>
    %93 = vector.shape_cast %92 : vector<1x8x128xf32> to vector<8x128xf32>
    %94 = vector.shape_cast %90 : vector<8x128xf32> to vector<1x8x128xf32>
    tpu.vector_store %arg13[%91, %c0_54, %c0_55], %94 {strides = array<i32>} : memref<8x8x128xf32, #tpu.memory_space<vmem>>, vector<1x8x128xf32>,
    %c8_i32 = arith.constant 8 : i32
    %c0_56 = arith.constant 0 : index
    %c0_57 = arith.constant 0 : index
    %c0_58 = arith.constant 0 : index
    %95 = vector.load %arg12[%c0_56, %c0_57, %c0_58] : memref<2x8x128xf32, #tpu.memory_space<vmem>>, vector<1x8x128xf32>
    %96 = vector.shape_cast %95 : vector<1x8x128xf32> to vector<8x128xf32>
    %97 = vector.shape_cast %90 : vector<8x128xf32> to vector<1x8x128xf32>
    tpu.vector_store %arg12[%c0_56, %c0_57, %c0_58], %97 {strides = array<i32>} : memref<2x8x128xf32, #tpu.memory_space<vmem>>, vector<1x8x128xf32>,
    %c0_59 = arith.constant 0 : index
    %c0_60 = arith.constant 0 : index
    %c0_61 = arith.constant 0 : index
    %98 = vector.load %arg13[%c0_59, %c0_60, %c0_61] : memref<8x8x128xf32, #tpu.memory_space<vmem>>, vector<8x8x128xf32>
    %99 = vector.shape_cast %98 : vector<8x8x128xf32> to vector<64x128xf32>
    %c0_62 = arith.constant 0 : index
    %c0_63 = arith.constant 0 : index
    %100 = vector.load %arg6[%c0_62, %c0_63] : memref<128x128xf32, #tpu.memory_space<vmem>>, vector<128x128xf32>
    %c0_64 = arith.constant 0 : index
    %c0_65 = arith.constant 0 : index
    %101 = vector.load %arg7[%c0_64, %c0_65] : memref<128x128xf32, #tpu.memory_space<vmem>>, vector<128x128xf32>
    %c0_66 = arith.constant 0 : index
    %c0_67 = arith.constant 0 : index
    %102 = vector.load %arg8[%c0_66, %c0_67] : memref<1x128xf32, #tpu.memory_space<vmem>>, vector<1x128xf32>
    %cst_68 = arith.constant dense<0.000000e+00> : vector<64x128xf32>
    %103 = tpu.matmul %99, %100, %cst_68 {dimension_numbers = #tpu.dot_dimension_numbers<[1], [0], [0], [1], [0, 0, 1, 1], [], []>} : vector<64x128xf32>, vector<128x128xf32>, vector<64x128xf32> -> vector<64x128xf32>
    %104 = vector.broadcast %102 : vector<1x128xf32> to vector<64x128xf32>
    %105 = arith.addf %103, %104 : vector<64x128xf32>
    %106 = vector.shape_cast %105 : vector<64x128xf32> to vector<8x8x128xf32>
    %c0_69 = arith.constant 0 : index
    %c0_70 = arith.constant 0 : index
    %c0_71 = arith.constant 0 : index
    %107 = vector.load %arg13[%c0_69, %c0_70, %c0_71] : memref<8x8x128xf32, #tpu.memory_space<vmem>>, vector<8x8x128xf32>
    tpu.vector_store %arg13[%c0_69, %c0_70, %c0_71], %106 {strides = array<i32>} : memref<8x8x128xf32, #tpu.memory_space<vmem>>, vector<8x8x128xf32>,
    %c1 = arith.constant 1 : index
    %c0_72 = arith.constant 0 : index
    %c0_73 = arith.constant 0 : index
    %108 = vector.load %arg12[%c1, %c0_72, %c0_73] : memref<2x8x128xf32, #tpu.memory_space<vmem>>, vector<1x8x128xf32>
    %109 = vector.shape_cast %108 : vector<1x8x128xf32> to vector<8x128xf32>
    %c0_i32_74 = arith.constant 0 : i32
    %110 = arith.index_cast %c0_i32_74 : i32 to index
    %c0_75 = arith.constant 0 : index
    %c0_76 = arith.constant 0 : index
    %111 = vector.load %arg13[%110, %c0_75, %c0_76] : memref<8x8x128xf32, #tpu.memory_space<vmem>>, vector<1x8x128xf32>
    %112 = vector.shape_cast %111 : vector<1x8x128xf32> to vector<8x128xf32>
    %cst_77 = arith.constant dense<0.000000e+00> : vector<8x128xf32>
    %113 = tpu.matmul %109, %101, %cst_77 {dimension_numbers = #tpu.dot_dimension_numbers<[1], [0], [0], [1], [0, 0, 1, 1], [], []>} : vector<8x128xf32>, vector<128x128xf32>, vector<8x128xf32> -> vector<8x128xf32>
    %114 = arith.addf %112, %113 : vector<8x128xf32>
    %115 = math.tanh %114 : vector<8x128xf32>
    %116 = arith.index_cast %c0_i32_74 : i32 to index
    %c0_78 = arith.constant 0 : index
    %c0_79 = arith.constant 0 : index
    %117 = vector.load %arg13[%116, %c0_78, %c0_79] : memref<8x8x128xf32, #tpu.memory_space<vmem>>, vector<1x8x128xf32>
    %118 = vector.shape_cast %117 : vector<1x8x128xf32> to vector<8x128xf32>
    %119 = vector.shape_cast %115 : vector<8x128xf32> to vector<1x8x128xf32>
    tpu.vector_store %arg13[%116, %c0_78, %c0_79], %119 {strides = array<i32>} : memref<8x8x128xf32, #tpu.memory_space<vmem>>, vector<1x8x128xf32>,
    %c1_i32_80 = arith.constant 1 : i32
    %120 = arith.index_cast %c1_i32_80 : i32 to index
    %c0_81 = arith.constant 0 : index
    %c0_82 = arith.constant 0 : index
    %121 = vector.load %arg13[%120, %c0_81, %c0_82] : memref<8x8x128xf32, #tpu.memory_space<vmem>>, vector<1x8x128xf32>
    %122 = vector.shape_cast %121 : vector<1x8x128xf32> to vector<8x128xf32>
    %cst_83 = arith.constant dense<0.000000e+00> : vector<8x128xf32>
    %123 = tpu.matmul %115, %101, %cst_83 {dimension_numbers = #tpu.dot_dimension_numbers<[1], [0], [0], [1], [0, 0, 1, 1], [], []>} : vector<8x128xf32>, vector<128x128xf32>, vector<8x128xf32> -> vector<8x128xf32>
    %124 = arith.addf %122, %123 : vector<8x128xf32>
    %125 = math.tanh %124 : vector<8x128xf32>
    %126 = arith.index_cast %c1_i32_80 : i32 to index
    %c0_84 = arith.constant 0 : index
    %c0_85 = arith.constant 0 : index
    %127 = vector.load %arg13[%126, %c0_84, %c0_85] : memref<8x8x128xf32, #tpu.memory_space<vmem>>, vector<1x8x128xf32>
    %128 = vector.shape_cast %127 : vector<1x8x128xf32> to vector<8x128xf32>
    %129 = vector.shape_cast %125 : vector<8x128xf32> to vector<1x8x128xf32>
    tpu.vector_store %arg13[%126, %c0_84, %c0_85], %129 {strides = array<i32>} : memref<8x8x128xf32, #tpu.memory_space<vmem>>, vector<1x8x128xf32>,
    %c2_i32_86 = arith.constant 2 : i32
    %130 = arith.index_cast %c2_i32_86 : i32 to index
    %c0_87 = arith.constant 0 : index
    %c0_88 = arith.constant 0 : index
    %131 = vector.load %arg13[%130, %c0_87, %c0_88] : memref<8x8x128xf32, #tpu.memory_space<vmem>>, vector<1x8x128xf32>
    %132 = vector.shape_cast %131 : vector<1x8x128xf32> to vector<8x128xf32>
    %cst_89 = arith.constant dense<0.000000e+00> : vector<8x128xf32>
    %133 = tpu.matmul %125, %101, %cst_89 {dimension_numbers = #tpu.dot_dimension_numbers<[1], [0], [0], [1], [0, 0, 1, 1], [], []>} : vector<8x128xf32>, vector<128x128xf32>, vector<8x128xf32> -> vector<8x128xf32>
    %134 = arith.addf %132, %133 : vector<8x128xf32>
    %135 = math.tanh %134 : vector<8x128xf32>
    %136 = arith.index_cast %c2_i32_86 : i32 to index
    %c0_90 = arith.constant 0 : index
    %c0_91 = arith.constant 0 : index
    %137 = vector.load %arg13[%136, %c0_90, %c0_91] : memref<8x8x128xf32, #tpu.memory_space<vmem>>, vector<1x8x128xf32>
    %138 = vector.shape_cast %137 : vector<1x8x128xf32> to vector<8x128xf32>
    %139 = vector.shape_cast %135 : vector<8x128xf32> to vector<1x8x128xf32>
    tpu.vector_store %arg13[%136, %c0_90, %c0_91], %139 {strides = array<i32>} : memref<8x8x128xf32, #tpu.memory_space<vmem>>, vector<1x8x128xf32>,
    %c3_i32_92 = arith.constant 3 : i32
    %140 = arith.index_cast %c3_i32_92 : i32 to index
    %c0_93 = arith.constant 0 : index
    %c0_94 = arith.constant 0 : index
    %141 = vector.load %arg13[%140, %c0_93, %c0_94] : memref<8x8x128xf32, #tpu.memory_space<vmem>>, vector<1x8x128xf32>
    %142 = vector.shape_cast %141 : vector<1x8x128xf32> to vector<8x128xf32>
    %cst_95 = arith.constant dense<0.000000e+00> : vector<8x128xf32>
    %143 = tpu.matmul %135, %101, %cst_95 {dimension_numbers = #tpu.dot_dimension_numbers<[1], [0], [0], [1], [0, 0, 1, 1], [], []>} : vector<8x128xf32>, vector<128x128xf32>, vector<8x128xf32> -> vector<8x128xf32>
    %144 = arith.addf %142, %143 : vector<8x128xf32>
    %145 = math.tanh %144 : vector<8x128xf32>
    %146 = arith.index_cast %c3_i32_92 : i32 to index
    %c0_96 = arith.constant 0 : index
    %c0_97 = arith.constant 0 : index
    %147 = vector.load %arg13[%146, %c0_96, %c0_97] : memref<8x8x128xf32, #tpu.memory_space<vmem>>, vector<1x8x128xf32>
    %148 = vector.shape_cast %147 : vector<1x8x128xf32> to vector<8x128xf32>
    %149 = vector.shape_cast %145 : vector<8x128xf32> to vector<1x8x128xf32>
    tpu.vector_store %arg13[%146, %c0_96, %c0_97], %149 {strides = array<i32>} : memref<8x8x128xf32, #tpu.memory_space<vmem>>, vector<1x8x128xf32>,
    %c4_i32_98 = arith.constant 4 : i32
    %150 = arith.index_cast %c4_i32_98 : i32 to index
    %c0_99 = arith.constant 0 : index
    %c0_100 = arith.constant 0 : index
    %151 = vector.load %arg13[%150, %c0_99, %c0_100] : memref<8x8x128xf32, #tpu.memory_space<vmem>>, vector<1x8x128xf32>
    %152 = vector.shape_cast %151 : vector<1x8x128xf32> to vector<8x128xf32>
    %cst_101 = arith.constant dense<0.000000e+00> : vector<8x128xf32>
    %153 = tpu.matmul %145, %101, %cst_101 {dimension_numbers = #tpu.dot_dimension_numbers<[1], [0], [0], [1], [0, 0, 1, 1], [], []>} : vector<8x128xf32>, vector<128x128xf32>, vector<8x128xf32> -> vector<8x128xf32>
    %154 = arith.addf %152, %153 : vector<8x128xf32>
    %155 = math.tanh %154 : vector<8x128xf32>
    %156 = arith.index_cast %c4_i32_98 : i32 to index
    %c0_102 = arith.constant 0 : index
    %c0_103 = arith.constant 0 : index
    %157 = vector.load %arg13[%156, %c0_102, %c0_103] : memref<8x8x128xf32, #tpu.memory_space<vmem>>, vector<1x8x128xf32>
    %158 = vector.shape_cast %157 : vector<1x8x128xf32> to vector<8x128xf32>
    %159 = vector.shape_cast %155 : vector<8x128xf32> to vector<1x8x128xf32>
    tpu.vector_store %arg13[%156, %c0_102, %c0_103], %159 {strides = array<i32>} : memref<8x8x128xf32, #tpu.memory_space<vmem>>, vector<1x8x128xf32>,
    %c5_i32_104 = arith.constant 5 : i32
    %160 = arith.index_cast %c5_i32_104 : i32 to index
    %c0_105 = arith.constant 0 : index
    %c0_106 = arith.constant 0 : index
    %161 = vector.load %arg13[%160, %c0_105, %c0_106] : memref<8x8x128xf32, #tpu.memory_space<vmem>>, vector<1x8x128xf32>
    %162 = vector.shape_cast %161 : vector<1x8x128xf32> to vector<8x128xf32>
    %cst_107 = arith.constant dense<0.000000e+00> : vector<8x128xf32>
    %163 = tpu.matmul %155, %101, %cst_107 {dimension_numbers = #tpu.dot_dimension_numbers<[1], [0], [0], [1], [0, 0, 1, 1], [], []>} : vector<8x128xf32>, vector<128x128xf32>, vector<8x128xf32> -> vector<8x128xf32>
    %164 = arith.addf %162, %163 : vector<8x128xf32>
    %165 = math.tanh %164 : vector<8x128xf32>
    %166 = arith.index_cast %c5_i32_104 : i32 to index
    %c0_108 = arith.constant 0 : index
    %c0_109 = arith.constant 0 : index
    %167 = vector.load %arg13[%166, %c0_108, %c0_109] : memref<8x8x128xf32, #tpu.memory_space<vmem>>, vector<1x8x128xf32>
    %168 = vector.shape_cast %167 : vector<1x8x128xf32> to vector<8x128xf32>
    %169 = vector.shape_cast %165 : vector<8x128xf32> to vector<1x8x128xf32>
    tpu.vector_store %arg13[%166, %c0_108, %c0_109], %169 {strides = array<i32>} : memref<8x8x128xf32, #tpu.memory_space<vmem>>, vector<1x8x128xf32>,
    %c6_i32_110 = arith.constant 6 : i32
    %170 = arith.index_cast %c6_i32_110 : i32 to index
    %c0_111 = arith.constant 0 : index
    %c0_112 = arith.constant 0 : index
    %171 = vector.load %arg13[%170, %c0_111, %c0_112] : memref<8x8x128xf32, #tpu.memory_space<vmem>>, vector<1x8x128xf32>
    %172 = vector.shape_cast %171 : vector<1x8x128xf32> to vector<8x128xf32>
    %cst_113 = arith.constant dense<0.000000e+00> : vector<8x128xf32>
    %173 = tpu.matmul %165, %101, %cst_113 {dimension_numbers = #tpu.dot_dimension_numbers<[1], [0], [0], [1], [0, 0, 1, 1], [], []>} : vector<8x128xf32>, vector<128x128xf32>, vector<8x128xf32> -> vector<8x128xf32>
    %174 = arith.addf %172, %173 : vector<8x128xf32>
    %175 = math.tanh %174 : vector<8x128xf32>
    %176 = arith.index_cast %c6_i32_110 : i32 to index
    %c0_114 = arith.constant 0 : index
    %c0_115 = arith.constant 0 : index
    %177 = vector.load %arg13[%176, %c0_114, %c0_115] : memref<8x8x128xf32, #tpu.memory_space<vmem>>, vector<1x8x128xf32>
    %178 = vector.shape_cast %177 : vector<1x8x128xf32> to vector<8x128xf32>
    %179 = vector.shape_cast %175 : vector<8x128xf32> to vector<1x8x128xf32>
    tpu.vector_store %arg13[%176, %c0_114, %c0_115], %179 {strides = array<i32>} : memref<8x8x128xf32, #tpu.memory_space<vmem>>, vector<1x8x128xf32>,
    %c7_i32_116 = arith.constant 7 : i32
    %180 = arith.index_cast %c7_i32_116 : i32 to index
    %c0_117 = arith.constant 0 : index
    %c0_118 = arith.constant 0 : index
    %181 = vector.load %arg13[%180, %c0_117, %c0_118] : memref<8x8x128xf32, #tpu.memory_space<vmem>>, vector<1x8x128xf32>
    %182 = vector.shape_cast %181 : vector<1x8x128xf32> to vector<8x128xf32>
    %cst_119 = arith.constant dense<0.000000e+00> : vector<8x128xf32>
    %183 = tpu.matmul %175, %101, %cst_119 {dimension_numbers = #tpu.dot_dimension_numbers<[1], [0], [0], [1], [0, 0, 1, 1], [], []>} : vector<8x128xf32>, vector<128x128xf32>, vector<8x128xf32> -> vector<8x128xf32>
    %184 = arith.addf %182, %183 : vector<8x128xf32>
    %185 = math.tanh %184 : vector<8x128xf32>
    %186 = arith.index_cast %c7_i32_116 : i32 to index
    %c0_120 = arith.constant 0 : index
    %c0_121 = arith.constant 0 : index
    %187 = vector.load %arg13[%186, %c0_120, %c0_121] : memref<8x8x128xf32, #tpu.memory_space<vmem>>, vector<1x8x128xf32>
    %188 = vector.shape_cast %187 : vector<1x8x128xf32> to vector<8x128xf32>
    %189 = vector.shape_cast %185 : vector<8x128xf32> to vector<1x8x128xf32>
    tpu.vector_store %arg13[%186, %c0_120, %c0_121], %189 {strides = array<i32>} : memref<8x8x128xf32, #tpu.memory_space<vmem>>, vector<1x8x128xf32>,
    %c8_i32_122 = arith.constant 8 : i32
    %c1_123 = arith.constant 1 : index
    %c0_124 = arith.constant 0 : index
    %c0_125 = arith.constant 0 : index
    %190 = vector.load %arg12[%c1_123, %c0_124, %c0_125] : memref<2x8x128xf32, #tpu.memory_space<vmem>>, vector<1x8x128xf32>
    %191 = vector.shape_cast %190 : vector<1x8x128xf32> to vector<8x128xf32>
    %192 = vector.shape_cast %185 : vector<8x128xf32> to vector<1x8x128xf32>
    tpu.vector_store %arg12[%c1_123, %c0_124, %c0_125], %192 {strides = array<i32>} : memref<2x8x128xf32, #tpu.memory_space<vmem>>, vector<1x8x128xf32>,
    %c0_126 = arith.constant 0 : index
    %c0_127 = arith.constant 0 : index
    %c0_128 = arith.constant 0 : index
    %193 = vector.load %arg13[%c0_126, %c0_127, %c0_128] : memref<8x8x128xf32, #tpu.memory_space<vmem>>, vector<8x8x128xf32>
    %194 = vector.shape_cast %193 : vector<8x8x128xf32> to vector<64x128xf32>
    %c0_129 = arith.constant 0 : index
    %c0_130 = arith.constant 0 : index
    %195 = vector.load %arg9[%c0_129, %c0_130] : memref<128x4xf32, #tpu.memory_space<vmem>>, vector<128x4xf32>
    %cst_131 = arith.constant dense<0.000000e+00> : vector<64x4xf32>
    %196 = tpu.matmul %194, %195, %cst_131 {dimension_numbers = #tpu.dot_dimension_numbers<[1], [0], [0], [1], [0, 0, 1, 1], [], []>} : vector<64x128xf32>, vector<128x4xf32>, vector<64x4xf32> -> vector<64x4xf32>
    %c0_132 = arith.constant 0 : index
    %c0_133 = arith.constant 0 : index
    %197 = vector.load %arg10[%c0_132, %c0_133] : memref<1x4xf32, #tpu.memory_space<vmem>>, vector<1x4xf32>
    %198 = vector.broadcast %197 : vector<1x4xf32> to vector<64x4xf32>
    %199 = arith.addf %196, %198 : vector<64x4xf32>
    %200 = vector.shape_cast %199 : vector<64x4xf32> to vector<8x8x4xf32>
    %c0_134 = arith.constant 0 : index
    %c0_135 = arith.constant 0 : index
    %c0_136 = arith.constant 0 : index
    %201 = vector.load %arg11[%c0_134, %c0_135, %c0_136] : memref<8x8x4xf32, #tpu.memory_space<vmem>>, vector<8x8x4xf32>
    tpu.vector_store %arg11[%c0_134, %c0_135, %c0_136], %200 {strides = array<i32>} : memref<8x8x4xf32, #tpu.memory_space<vmem>>, vector<8x8x4xf32>,
    return
  }
  func.func @transform_0(%arg0: i32, %arg1: i32) -> (i32, i32, i32) {
    %c0_i32 = arith.constant 0 : i32
    %c0_i32_0 = arith.constant 0 : i32
    return %arg1, %arg0, %c0_i32 : i32, i32, i32
  }
  func.func @transform_1(%arg0: i32, %arg1: i32) -> (i32, i32) {
    %c0_i32 = arith.constant 0 : i32
    %c0_i32_0 = arith.constant 0 : i32
    %c0_i32_1 = arith.constant 0 : i32
    return %c0_i32, %c0_i32_0 : i32, i32
  }
  func.func @transform_2(%arg0: i32, %arg1: i32) -> (i32, i32) {
    %c0_i32 = arith.constant 0 : i32
    %c0_i32_0 = arith.constant 0 : i32
    %c0_i32_1 = arith.constant 0 : i32
    return %c0_i32, %c0_i32_0 : i32, i32
  }
  func.func @transform_3(%arg0: i32, %arg1: i32) -> (i32, i32) {
    %c0_i32 = arith.constant 0 : i32
    %c0_i32_0 = arith.constant 0 : i32
    %c0_i32_1 = arith.constant 0 : i32
    return %c0_i32, %c0_i32_0 : i32, i32
  }
  func.func @transform_4(%arg0: i32, %arg1: i32) -> (i32, i32) {
    %c0_i32 = arith.constant 0 : i32
    %c0_i32_0 = arith.constant 0 : i32
    %c0_i32_1 = arith.constant 0 : i32
    return %c0_i32, %c0_i32_0 : i32, i32
  }
  func.func @transform_5(%arg0: i32, %arg1: i32) -> (i32, i32) {
    %c0_i32 = arith.constant 0 : i32
    %c0_i32_0 = arith.constant 0 : i32
    %c0_i32_1 = arith.constant 0 : i32
    return %c0_i32, %c0_i32_0 : i32, i32
  }
  func.func @transform_6(%arg0: i32, %arg1: i32) -> (i32, i32) {
    %c0_i32 = arith.constant 0 : i32
    %c0_i32_0 = arith.constant 0 : i32
    %c0_i32_1 = arith.constant 0 : i32
    return %c0_i32, %c0_i32_0 : i32, i32
  }
  func.func @transform_7(%arg0: i32, %arg1: i32) -> (i32, i32) {
    %c0_i32 = arith.constant 0 : i32
    %c0_i32_0 = arith.constant 0 : i32
    %c0_i32_1 = arith.constant 0 : i32
    return %c0_i32, %c0_i32_0 : i32, i32
  }
  func.func @transform_8(%arg0: i32, %arg1: i32) -> (i32, i32) {
    %c0_i32 = arith.constant 0 : i32
    %c0_i32_0 = arith.constant 0 : i32
    %c0_i32_1 = arith.constant 0 : i32
    return %c0_i32, %c0_i32_0 : i32, i32
  }
  func.func @transform_9(%arg0: i32, %arg1: i32) -> (i32, i32, i32) {
    %c0_i32 = arith.constant 0 : i32
    %c0_i32_0 = arith.constant 0 : i32
    return %arg1, %arg0, %c0_i32 : i32, i32, i32
  }
}

</mosaic_0001>

<bundles_post_ra>
// kernel: rnn_forward.1
= control target key start
LH: loop header
LB: loop body
LE: loop exit
PB: predicated region body
PF: predicated region fallthrough
CT: control target
= control target key end

     0   :  { %vm95_vm0 = vcmask 1043456   ;;  %vm70_vm1 = vcmask 31744   ;;  %v2753_v3 = vmov 0.0   ;;  %vm2754_vm2 = vmmov 0   ;;  %s3766_s1 = inlined_call_operand.vmem [shape: f32[4,128], index: 1, kind: input, shape index: {}]   ;;  %s3767_s0 = inlined_call_operand.vmem [shape: f32[8,8,4], index: 0, kind: input, shape index: {}]   ;;  %s3768_s2 = inlined_call_operand.vmem [shape: f32[128,128], index: 2, kind: input, shape index: {}]   ;;  %s3769_s3 = inlined_call_operand.vmem [shape: f32[1,128], index: 3, kind: input, shape index: {}]   ;;  %s3770_s4 = inlined_call_operand.vmem [shape: f32[128,128], index: 4, kind: input, shape index: {}]   ;;  %s3771_s5 = inlined_call_operand.vmem [shape: f32[128,128], index: 5, kind: input, shape index: {}]   ;;  %s3772_s6 = inlined_call_operand.vmem [shape: f32[1,128], index: 6, kind: input, shape index: {}]   ;;  %s3773_s7 = inlined_call_operand.vmem [shape: f32[128,4], index: 7, kind: input, shape index: {}]   ;;  %s3774_s8 = inlined_call_operand.vmem [shape: f32[1,4], index: 8, kind: input, shape index: {}]   ;;  %s3775_s9 = inlined_call_operand.vmem [shape: f32[8,8,4], index: 9, kind: output, shape index: {}]  }
   0x1   :  { %v46_v0 = vld [vmem:[%s3766_s1] sm:$0xf]  ;;  %v39_v2 = vld [vmem:[%s3767_s0 + $0x8] sm:$0xff]  ;;  %2106 = vmatprep.subr.mxu0 %v2753_v3  ;;  %2138 = vmatprep.mubr.msk.f32.mxu0 %vm2754_vm2, %v2753_v3  ;;  %v2821_v4 = vld [vmem:[%s3768_s2 + $0x78] sm:$0xff] }
   0x2   :  { %v38_v1 = vld [vmem:[%s3767_s0] sm:$0xff]  ;;  %2057 = vmatprep.subr.msk.mxu1 %vm95_vm0, %v46_v0  ;;  %2107 = vmatpush3.msra.mxu0 %v2821_v4  ;;  %v2829_v5 = vld [vmem:[%s3768_s2 + $0x70] sm:$0xff]  ;;  %v41_v7 = vld [vmem:[%s3767_s0 + $0x18] sm:$0xff] }
   0x3   :  { %2059 = vmatprep.mubr.msk.f32.mxu1 %vm70_vm1, %v38_v1  ;;  %2058 = vmatpush3.msk.msra.mxu1 %vm95_vm0, %v46_v0  ;;  %v40_v6 = vld [vmem:[%s3767_s0 + $0x10] sm:$0xff]  ;;  %v2843_v8 = vld [vmem:[%s3768_s2 + $0x68] sm:$0xff]  ;;  %v42_v9 = vld [vmem:[%s3767_s0 + $0x20] sm:$0xff] }
   0x4   :  { %2060 = vmatmul.mubr.msk.f32.vlgmr.msra.gmra.mxu1 %vm70_vm1, %v39_v2  ;;  %2071 = vmatprep.subr.mxu1 %v2753_v3  ;;  %v2855_v10 = vld [vmem:[%s3768_s2 + $0x60] sm:$0xff]  ;;  %v43_v11 = vld [vmem:[%s3767_s0 + $0x28] sm:$0xff]  ;;  %v2867_v12 = vld [vmem:[%s3768_s2 + $0x58] sm:$0xff] }
   0x5   :  { %2072 = vmatpush3.msra.mxu1 %v2821_v4  ;;  %2062 = vmatprep.mubr.msk.f32.mxu1 %vm70_vm1, %v40_v6  ;;  %v44_v13 = vld [vmem:[%s3767_s0 + $0x30] sm:$0xff]  ;;  %v45_v15 = vld [vmem:[%s3767_s0 + $0x38] sm:$0xff]  ;;  %v2891_v16 = vld [vmem:[%s3768_s2 + $0x48] sm:$0xff] }
   0x6   :  { %2073 = vmatprep.subr.mxu1 %v2753_v3  ;;  %2108 = vmatprep.subr.mxu0 %v2753_v3  ;;  %v2879_v14 = vld [vmem:[%s3768_s2 + $0x50] sm:$0xff]  ;;  %v2900_v17 = vld [vmem:[%s3768_s2 + $0x40] sm:$0xff]  ;;  %v2910_v18 = vld [vmem:[%s3768_s2 + $0x38] sm:$0xff] }
   0x7   :  { %2074 = vmatpush3.msra.mxu1 %v2829_v5  ;;  %2109 = vmatpush3.msra.mxu0 %v2829_v5  ;;  %v2919_v19 = vld [vmem:[%s3768_s2 + $0x30] sm:$0xff]  ;;  %v2928_v20 = vld [vmem:[%s3768_s2 + $0x28] sm:$0xff]  ;;  %v2937_v21 = vld [vmem:[%s3768_s2 + $0x20] sm:$0xff] }
   0x8   :  { %2075 = vmatprep.subr.mxu1 %v2753_v3  ;;  %2063 = vmatmul.mubr.msk.f32.gmra.mxu1 %vm70_vm1, %v41_v7  ;;  %v2946_v22 = vld [vmem:[%s3768_s2 + $0x18] sm:$0xff]  ;;  %v2955_v23 = vld [vmem:[%s3768_s2 + $0x10] sm:$0xff]  ;;  %v2964_v24 = vld [vmem:[%s3768_s2 + $0x8] sm:$0xff] }
   0x9   :  { %2076 = vmatpush3.msra.mxu1 %v2843_v8  ;;  %2065 = vmatprep.mubr.msk.f32.mxu1 %vm70_vm1, %v42_v9  ;;  %v2973_v25 = vld [vmem:[%s3768_s2] sm:$0xff]  ;;  %v836_v63 = vld [vmem:[%s3770_s4 + $0x78] sm:$0xff]  ;;  %v834_v6 = vld [vmem:[%s3770_s4 + $0x68] sm:$0xff] }
   0xa   :  { %2077 = vmatprep.subr.mxu1 %v2753_v3  ;;  %2110 = vmatprep.subr.mxu0 %v2753_v3  ;;  %v1716_v26 = vld [vmem:[%s3769_s3] ss:$0 sm:$0xff]  ;;  %v831_v9 = vld [vmem:[%s3770_s4 + $0x50] sm:$0xff] }
   0xb   :  { %2078 = vmatpush3.msra.mxu1 %v2855_v10  ;;  %2111 = vmatpush3.msra.mxu0 %v2843_v8  ;;  %v833_v7 = vld [vmem:[%s3770_s4 + $0x60] sm:$0xff] }
   0xc   :  { %2079 = vmatprep.subr.mxu1 %v2753_v3  ;;  %2066 = vmatmul.mubr.msk.f32.gmra.mxu1 %vm70_vm1, %v43_v11  ;;  %v829_v11 = vld [vmem:[%s3770_s4 + $0x40] sm:$0xff] }
   0xd   :  { %2080 = vmatpush3.msra.mxu1 %v2867_v12  ;;  %2068 = vmatprep.mubr.msk.f32.mxu1 %vm70_vm1, %v44_v13  ;;  %v827_v13 = vld [vmem:[%s3770_s4 + $0x30] sm:$0xff] }
   0xe   :  { %2081 = vmatprep.subr.mxu1 %v2753_v3  ;;  %2112 = vmatprep.subr.mxu0 %v2753_v3 }
   0xf   :  { %2082 = vmatpush3.msra.mxu1 %v2879_v14  ;;  %2113 = vmatpush3.msra.mxu0 %v2855_v10 }
  0x10   :  { %2083 = vmatprep.subr.mxu1 %v2753_v3  ;;  %2069 = vmatmul.mubr.msk.f32.gmra.mxu1 %vm70_vm1, %v45_v15  ;;  %v825_v15 = vld [vmem:[%s3770_s4 + $0x20] sm:$0xff] }
  0x11   :  { %2084 = vmatpush3.msra.mxu1 %v2891_v16  ;;  %2103 = vmatprep.mubr.msk.f32.mxu1 %vm2754_vm2, %v2753_v3 }
  0x12   :  { %2085 = vmatprep.subr.mxu1 %v2753_v3  ;;  %2114 = vmatprep.subr.mxu0 %v2753_v3 }
  0x13   :  { %2086 = vmatpush3.msra.mxu1 %v2900_v17  ;;  %2115 = vmatpush3.msra.mxu0 %v2867_v12 }
  0x14   :  { %2087 = vmatprep.subr.mxu1 %v2753_v3  ;;  %2116 = vmatprep.subr.mxu0 %v2753_v3 }
  0x15   :  { %2088 = vmatpush3.msra.mxu1 %v2910_v18  ;;  %2117 = vmatpush3.msra.mxu0 %v2879_v14 }
  0x16   :  { %2089 = vmatprep.subr.mxu1 %v2753_v3  ;;  %2118 = vmatprep.subr.mxu0 %v2753_v3 }
  0x17   :  { %2090 = vmatpush3.msra.mxu1 %v2919_v19  ;;  %2119 = vmatpush3.msra.mxu0 %v2891_v16 }
  0x18   :  { %2091 = vmatprep.subr.mxu1 %v2753_v3  ;;  %2120 = vmatprep.subr.mxu0 %v2753_v3 }
  0x19   :  { %2092 = vmatpush3.msra.mxu1 %v2928_v20  ;;  %2121 = vmatpush3.msra.mxu0 %v2900_v17 }
  0x1a   :  { %2093 = vmatprep.subr.mxu1 %v2753_v3  ;;  %2122 = vmatprep.subr.mxu0 %v2753_v3 }
  0x1b   :  { %2094 = vmatpush3.msra.mxu1 %v2937_v21  ;;  %2123 = vmatpush3.msra.mxu0 %v2910_v18 }
  0x1c   :  { %2095 = vmatprep.subr.mxu1 %v2753_v3  ;;  %2124 = vmatprep.subr.mxu0 %v2753_v3 }
  0x1d   :  { %2096 = vmatpush3.msra.mxu1 %v2946_v22  ;;  %2125 = vmatpush3.msra.mxu0 %v2919_v19 }
  0x1e   :  { %2097 = vmatprep.subr.mxu1 %v2753_v3  ;;  %2126 = vmatprep.subr.mxu0 %v2753_v3 }
  0x1f   :  { %2098 = vmatpush3.msra.mxu1 %v2955_v23  ;;  %2127 = vmatpush3.msra.mxu0 %v2928_v20 }
  0x20   :  { %2099 = vmatprep.subr.mxu1 %v2753_v3  ;;  %2128 = vmatprep.subr.mxu0 %v2753_v3 }
  0x21   :  { %2100 = vmatpush3.msra.mxu1 %v2964_v24  ;;  %2129 = vmatpush3.msra.mxu0 %v2937_v21 }
  0x22   :  { %2101 = vmatprep.subr.mxu1 %v2753_v3  ;;  %2130 = vmatprep.subr.mxu0 %v2753_v3 }
  0x23   :  { %2102 = vmatpush3.msra.mxu1 %v2973_v25  ;;  %2131 = vmatpush3.msra.mxu0 %v2946_v22 }
  0x24   :  { %2104 = vmatmul.mubr.f32.vlgmr.msra.gmra.mxu1 %v2753_v3  ;;  %2132 = vmatprep.subr.mxu0 %v2753_v3 }
  0x25   :  { %2133 = vmatpush3.msra.mxu0 %v2955_v23  ;;  %2141 = vmatprep.subr.mxu1 %v2753_v3 }
  0x26   :  { %2134 = vmatprep.subr.mxu0 %v2753_v3  ;;  %2142 = vmatpush3.msra.mxu1 %v2821_v4 }
  0x27   :  { %2135 = vmatpush3.msra.mxu0 %v2964_v24  ;;  %2143 = vmatprep.subr.mxu1 %v2753_v3 }
  0x28   :  { %2136 = vmatprep.subr.mxu0 %v2753_v3  ;;  %2144 = vmatpush3.msra.mxu1 %v2829_v5 }
  0x29   :  { %2137 = vmatpush3.msra.mxu0 %v2973_v25  ;;  %2145 = vmatprep.subr.mxu1 %v2753_v3 }
  0x2a   :  { %2146 = vmatpush3.msra.mxu1 %v2843_v8  ;;  %2173 = vmatprep.mubr.msk.f32.mxu1 %vm2754_vm2, %v2753_v3 }
  0x2b   :  { %2147 = vmatprep.subr.mxu1 %v2753_v3  ;;  %2176 = vmatprep.subr.mxu0 %v2753_v3 }
  0x2c   :  { %2148 = vmatpush3.msra.mxu1 %v2855_v10 }
  0x2d   :  { %2149 = vmatprep.subr.mxu1 %v2753_v3 }
  0x2e   :  { %2150 = vmatpush3.msra.mxu1 %v2867_v12 }
  0x2f   :  { %2151 = vmatprep.subr.mxu1 %v2753_v3 }
  0x30   :  { %2152 = vmatpush3.msra.mxu1 %v2879_v14 }
  0x31   :  { %2153 = vmatprep.subr.mxu1 %v2753_v3 }
  0x32   :  { %2154 = vmatpush3.msra.mxu1 %v2891_v16 }
  0x33   :  { %2155 = vmatprep.subr.mxu1 %v2753_v3 }
  0x34   :  { %2156 = vmatpush3.msra.mxu1 %v2900_v17 }
  0x35   :  { %2157 = vmatprep.subr.mxu1 %v2753_v3 }
  0x36   :  { %2158 = vmatpush3.msra.mxu1 %v2910_v18 }
  0x37   :  { %2159 = vmatprep.subr.mxu1 %v2753_v3 }
  0x38   :  { %2160 = vmatpush3.msra.mxu1 %v2919_v19 }
  0x39   :  { %2161 = vmatprep.subr.mxu1 %v2753_v3 }
  0x3a   :  { %2162 = vmatpush3.msra.mxu1 %v2928_v20 }
  0x3b   :  { %2163 = vmatprep.subr.mxu1 %v2753_v3 }
  0x3c   :  { %2164 = vmatpush3.msra.mxu1 %v2937_v21 }
  0x3d   :  { %2165 = vmatprep.subr.mxu1 %v2753_v3 }
  0x3e   :  { %2166 = vmatpush3.msra.mxu1 %v2946_v22 }
  0x3f   :  { %2167 = vmatprep.subr.mxu1 %v2753_v3 }
  0x40   :  { %2168 = vmatpush3.msra.mxu1 %v2955_v23 }
  0x41   :  { %2169 = vmatprep.subr.mxu1 %v2753_v3 }
  0x42   :  { %2170 = vmatpush3.msra.mxu1 %v2964_v24 }
  0x43   :  { %2171 = vmatprep.subr.mxu1 %v2753_v3 }
  0x44   :  { %2172 = vmatpush3.msra.mxu1 %v2973_v25 }
  0x45   :  { %2211 = vmatprep.subr.mxu1 %v2753_v3 }
  0xc4   :  { %v2061_v27 = vpop.f32.mrf.mxu1 }
  0xc5   :  { %v171_v28 = vadd.f32 %v2061_v27, %v1716_v26  ;;  %v3333_v27 = vld [vmem:[%s3771_s5 + $0x40] sm:$0xff] }
  0xc6   :  { %v165_v29 = vpop.f32.mrf.mxu1 }
  0xc7   :  { %v166_v42 = vadd.f32 %v1716_v26, %v165_v29  ;;  %v3347_v29 = vld [vmem:[%s3771_s5 + $0x30] sm:$0xff] }
  0xc8   :  { %v2064_v30 = vpop.f32.mrf.mxu1 }
  0xc9   :  { %v3028_v31 = vadd.f32 %v2064_v30, %v1716_v26  ;;  %v3354_v30 = vld [vmem:[%s3771_s5 + $0x28] sm:$0xff] }
  0xca   :  { %v175_v32 = vpop.f32.mrf.mxu1 }
  0xcb   :  { %v3030_v33 = vadd.f32 %v1716_v26, %v175_v32  ;;  %v3368_v32 = vld [vmem:[%s3771_s5 + $0x18] sm:$0xff] }
  0xcc   :  { %v2067_v34 = vpop.f32.mrf.mxu1 }
  0xcd   :  { %v3032_v35 = vadd.f32 %v2067_v34, %v1716_v26  ;;  %v3382_v34 = vld [vmem:[%s3771_s5 + $0x8] sm:$0xff] }
  0xce   :  { %v185_v36 = vpop.f32.mrf.mxu1 }
  0xcf   :  { %v3034_v37 = vadd.f32 %v1716_v26, %v185_v36 }
  0xd0   :  { %v2070_v38 = vpop.f32.mrf.mxu1 }
  0xd1   :  { %v3036_v39 = vadd.f32 %v2070_v38, %v1716_v26 }
  0xd2   :  { %v195_v40 = vpop.f32.mrf.mxu1 }
  0xd3   :  { %v3038_v41 = vadd.f32 %v1716_v26, %v195_v40  ;;  %v3326_v26 = vld [vmem:[%s3771_s5 + $0x48] sm:$0xff] }
  0xe4   :  { %v280_v43 = vpop.f32.mrf.mxu1 }
  0xe5   :  { %v284_v44 = vadd.f32 %v280_v43, %v166_v42 }
  0xe6   :  { %v2105_v45 = vpop.f32.mrf.mxu1 }
  0xe7   :  { %2721 = vtanh.f32 %v284_v44 }
  0xf4   :  { %v3040_v46 = vpop.eup %2721 }
  0xf5   :  { %2139 = vmatmul.mubr.f32.vlgmr.msra.gmra.mxu0 %v3040_v46 }
  0xf6   :  { %2177 = vmatpush3.msra.mxu0 %v2821_v4  ;;  %2208 = vmatprep.mubr.msk.f32.mxu0 %vm2754_vm2, %v2753_v3 }
  0xf7   :  { %2178 = vmatprep.subr.mxu0 %v2753_v3 }
  0xf8   :  { %2179 = vmatpush3.msra.mxu0 %v2829_v5 }
  0xf9   :  { %2180 = vmatprep.subr.mxu0 %v2753_v3 }
  0xfa   :  { %2181 = vmatpush3.msra.mxu0 %v2843_v8 }
  0xfb   :  { %2182 = vmatprep.subr.mxu0 %v2753_v3 }
  0xfc   :  { %2183 = vmatpush3.msra.mxu0 %v2855_v10 }
  0xfd   :  { %2184 = vmatprep.subr.mxu0 %v2753_v3 }
  0xfe   :  { %2185 = vmatpush3.msra.mxu0 %v2867_v12 }
  0xff   :  { %2186 = vmatprep.subr.mxu0 %v2753_v3 }
 0x100   :  { %2187 = vmatpush3.msra.mxu0 %v2879_v14 }
 0x101   :  { %2188 = vmatprep.subr.mxu0 %v2753_v3 }
 0x102   :  { %2189 = vmatpush3.msra.mxu0 %v2891_v16 }
 0x103   :  { %2190 = vmatprep.subr.mxu0 %v2753_v3 }
 0x104   :  { %2191 = vmatpush3.msra.mxu0 %v2900_v17 }
 0x105   :  { %2192 = vmatprep.subr.mxu0 %v2753_v3 }
 0x106   :  { %2193 = vmatpush3.msra.mxu0 %v2910_v18 }
 0x107   :  { %2194 = vmatprep.subr.mxu0 %v2753_v3 }
 0x108   :  { %2195 = vmatpush3.msra.mxu0 %v2919_v19 }
 0x109   :  { %2196 = vmatprep.subr.mxu0 %v2753_v3 }
 0x10a   :  { %2197 = vmatpush3.msra.mxu0 %v2928_v20 }
 0x10b   :  { %2198 = vmatprep.subr.mxu0 %v2753_v3 }
 0x10c   :  { %2199 = vmatpush3.msra.mxu0 %v2937_v21 }
 0x10d   :  { %2200 = vmatprep.subr.mxu0 %v2753_v3 }
 0x10e   :  { %2201 = vmatpush3.msra.mxu0 %v2946_v22 }
 0x10f   :  { %2202 = vmatprep.subr.mxu0 %v2753_v3 }
 0x110   :  { %2203 = vmatpush3.msra.mxu0 %v2955_v23 }
 0x111   :  { %2204 = vmatprep.subr.mxu0 %v2753_v3 }
 0x112   :  { %2205 = vmatpush3.msra.mxu0 %v2964_v24 }
 0x113   :  { %2206 = vmatprep.subr.mxu0 %v2753_v3 }
 0x114   :  { %2207 = vmatpush3.msra.mxu0 %v2973_v25 }
 0x115   :  { %2246 = vmatprep.subr.mxu0 %v2753_v3 }
 0x1b5   :  { %v355_v47 = vpop.f32.mrf.mxu0 }
 0x1b6   :  { %v359_v48 = vadd.f32 %v355_v47, %v171_v28  ;;  %v3340_v28 = vld [vmem:[%s3771_s5 + $0x38] sm:$0xff]  ;;  %v3470_v47 = vld [vmem:[%s3772_s6] ss:$0 sm:$0xff] }
 0x1b7   :  { %v2140_v49 = vpop.f32.mrf.mxu0 }
 0x1b8   :  { %2723 = vtanh.f32 %v359_v48 }
 0x1c5   :  { %v3077_v50 = vpop.eup %2723 }
 0x1c6   :  { %2174 = vmatmul.mubr.f32.vlgmr.msra.gmra.mxu1 %v3077_v50 }
 0x1c7   :  { %2212 = vmatpush3.msra.mxu1 %v2821_v4  ;;  %2243 = vmatprep.mubr.msk.f32.mxu1 %vm2754_vm2, %v2753_v3 }
 0x1c8   :  { %2213 = vmatprep.subr.mxu1 %v2753_v3 }
 0x1c9   :  { %2214 = vmatpush3.msra.mxu1 %v2829_v5 }
 0x1ca   :  { %2215 = vmatprep.subr.mxu1 %v2753_v3 }
 0x1cb   :  { %2216 = vmatpush3.msra.mxu1 %v2843_v8 }
 0x1cc   :  { %2217 = vmatprep.subr.mxu1 %v2753_v3 }
 0x1cd   :  { %2218 = vmatpush3.msra.mxu1 %v2855_v10 }
 0x1ce   :  { %2219 = vmatprep.subr.mxu1 %v2753_v3 }
 0x1cf   :  { %2220 = vmatpush3.msra.mxu1 %v2867_v12 }
 0x1d0   :  { %2221 = vmatprep.subr.mxu1 %v2753_v3 }
 0x1d1   :  { %2222 = vmatpush3.msra.mxu1 %v2879_v14 }
 0x1d2   :  { %2223 = vmatprep.subr.mxu1 %v2753_v3 }
 0x1d3   :  { %2224 = vmatpush3.msra.mxu1 %v2891_v16 }
 0x1d4   :  { %2225 = vmatprep.subr.mxu1 %v2753_v3 }
 0x1d5   :  { %2226 = vmatpush3.msra.mxu1 %v2900_v17 }
 0x1d6   :  { %2227 = vmatprep.subr.mxu1 %v2753_v3 }
 0x1d7   :  { %2228 = vmatpush3.msra.mxu1 %v2910_v18 }
 0x1d8   :  { %2229 = vmatprep.subr.mxu1 %v2753_v3 }
 0x1d9   :  { %2230 = vmatpush3.msra.mxu1 %v2919_v19 }
 0x1da   :  { %2231 = vmatprep.subr.mxu1 %v2753_v3 }
 0x1db   :  { %2232 = vmatpush3.msra.mxu1 %v2928_v20 }
 0x1dc   :  { %2233 = vmatprep.subr.mxu1 %v2753_v3 }
 0x1dd   :  { %2234 = vmatpush3.msra.mxu1 %v2937_v21 }
 0x1de   :  { %2235 = vmatprep.subr.mxu1 %v2753_v3 }
 0x1df   :  { %2236 = vmatpush3.msra.mxu1 %v2946_v22 }
 0x1e0   :  { %2237 = vmatprep.subr.mxu1 %v2753_v3 }
 0x1e1   :  { %2238 = vmatpush3.msra.mxu1 %v2955_v23 }
 0x1e2   :  { %2239 = vmatprep.subr.mxu1 %v2753_v3 }
 0x1e3   :  { %2240 = vmatpush3.msra.mxu1 %v2964_v24 }
 0x1e4   :  { %2241 = vmatprep.subr.mxu1 %v2753_v3 }
 0x1e5   :  { %2242 = vmatpush3.msra.mxu1 %v2973_v25 }
 0x1e6   :  { %2281 = vmatprep.subr.mxu1 %v2753_v3 }
 0x286   :  { %v430_v51 = vpop.f32.mrf.mxu1 }
 0x287   :  { %v434_v52 = vadd.f32 %v430_v51, %v3030_v33  ;;  %v3375_v33 = vld [vmem:[%s3771_s5 + $0x10] sm:$0xff] }
 0x288   :  { %v2175_v53 = vpop.f32.mrf.mxu1 }
 0x289   :  { %2725 = vtanh.f32 %v434_v52 }
 0x296   :  { %v3115_v54 = vpop.eup %2725 }
 0x297   :  { %2209 = vmatmul.mubr.f32.vlgmr.msra.gmra.mxu0 %v3115_v54 }
 0x298   :  { %2247 = vmatpush3.msra.mxu0 %v2821_v4  ;;  %2278 = vmatprep.mubr.msk.f32.mxu0 %vm2754_vm2, %v2753_v3 }
 0x299   :  { %2248 = vmatprep.subr.mxu0 %v2753_v3 }
 0x29a   :  { %2249 = vmatpush3.msra.mxu0 %v2829_v5 }
 0x29b   :  { %2250 = vmatprep.subr.mxu0 %v2753_v3 }
 0x29c   :  { %2251 = vmatpush3.msra.mxu0 %v2843_v8 }
 0x29d   :  { %2252 = vmatprep.subr.mxu0 %v2753_v3 }
 0x29e   :  { %2253 = vmatpush3.msra.mxu0 %v2855_v10 }
 0x29f   :  { %2254 = vmatprep.subr.mxu0 %v2753_v3 }
 0x2a0   :  { %2255 = vmatpush3.msra.mxu0 %v2867_v12 }
 0x2a1   :  { %2256 = vmatprep.subr.mxu0 %v2753_v3 }
 0x2a2   :  { %2257 = vmatpush3.msra.mxu0 %v2879_v14 }
 0x2a3   :  { %2258 = vmatprep.subr.mxu0 %v2753_v3 }
 0x2a4   :  { %2259 = vmatpush3.msra.mxu0 %v2891_v16 }
 0x2a5   :  { %2260 = vmatprep.subr.mxu0 %v2753_v3 }
 0x2a6   :  { %2261 = vmatpush3.msra.mxu0 %v2900_v17 }
 0x2a7   :  { %2262 = vmatprep.subr.mxu0 %v2753_v3 }
 0x2a8   :  { %2263 = vmatpush3.msra.mxu0 %v2910_v18 }
 0x2a9   :  { %2264 = vmatprep.subr.mxu0 %v2753_v3 }
 0x2aa   :  { %2265 = vmatpush3.msra.mxu0 %v2919_v19 }
 0x2ab   :  { %2266 = vmatprep.subr.mxu0 %v2753_v3 }
 0x2ac   :  { %2267 = vmatpush3.msra.mxu0 %v2928_v20 }
 0x2ad   :  { %2268 = vmatprep.subr.mxu0 %v2753_v3 }
 0x2ae   :  { %2269 = vmatpush3.msra.mxu0 %v2937_v21 }
 0x2af   :  { %2270 = vmatprep.subr.mxu0 %v2753_v3 }
 0x2b0   :  { %2271 = vmatpush3.msra.mxu0 %v2946_v22 }
 0x2b1   :  { %2272 = vmatprep.subr.mxu0 %v2753_v3 }
 0x2b2   :  { %2273 = vmatpush3.msra.mxu0 %v2955_v23 }
 0x2b3   :  { %2274 = vmatprep.subr.mxu0 %v2753_v3 }
 0x2b4   :  { %2275 = vmatpush3.msra.mxu0 %v2964_v24 }
 0x2b5   :  { %2276 = vmatprep.subr.mxu0 %v2753_v3 }
 0x2b6   :  { %2277 = vmatpush3.msra.mxu0 %v2973_v25 }
 0x2b7   :  { %2316 = vmatprep.subr.mxu0 %v2753_v3 }
 0x357   :  { %v505_v55 = vpop.f32.mrf.mxu0 }
 0x358   :  { %v509_v56 = vadd.f32 %v505_v55, %v3028_v31  ;;  %v3361_v31 = vld [vmem:[%s3771_s5 + $0x20] sm:$0xff] }
 0x359   :  { %v2210_v57 = vpop.f32.mrf.mxu0 }
 0x35a   :  { %2727 = vtanh.f32 %v509_v56 }
 0x367   :  { %v3153_v58 = vpop.eup %2727 }
 0x368   :  { %2244 = vmatmul.mubr.f32.vlgmr.msra.gmra.mxu1 %v3153_v58 }
 0x369   :  { %2282 = vmatpush3.msra.mxu1 %v2821_v4  ;;  %2313 = vmatprep.mubr.msk.f32.mxu1 %vm2754_vm2, %v2753_v3 }
 0x36a   :  { %2283 = vmatprep.subr.mxu1 %v2753_v3 }
 0x36b   :  { %2284 = vmatpush3.msra.mxu1 %v2829_v5 }
 0x36c   :  { %2285 = vmatprep.subr.mxu1 %v2753_v3 }
 0x36d   :  { %2286 = vmatpush3.msra.mxu1 %v2843_v8 }
 0x36e   :  { %2287 = vmatprep.subr.mxu1 %v2753_v3 }
 0x36f   :  { %2288 = vmatpush3.msra.mxu1 %v2855_v10 }
 0x370   :  { %2289 = vmatprep.subr.mxu1 %v2753_v3 }
 0x371   :  { %2290 = vmatpush3.msra.mxu1 %v2867_v12 }
 0x372   :  { %2291 = vmatprep.subr.mxu1 %v2753_v3 }
 0x373   :  { %2292 = vmatpush3.msra.mxu1 %v2879_v14 }
 0x374   :  { %2293 = vmatprep.subr.mxu1 %v2753_v3 }
 0x375   :  { %2294 = vmatpush3.msra.mxu1 %v2891_v16 }
 0x376   :  { %2295 = vmatprep.subr.mxu1 %v2753_v3 }
 0x377   :  { %2296 = vmatpush3.msra.mxu1 %v2900_v17 }
 0x378   :  { %2297 = vmatprep.subr.mxu1 %v2753_v3 }
 0x379   :  { %2298 = vmatpush3.msra.mxu1 %v2910_v18 }
 0x37a   :  { %2299 = vmatprep.subr.mxu1 %v2753_v3 }
 0x37b   :  { %2300 = vmatpush3.msra.mxu1 %v2919_v19 }
 0x37c   :  { %2301 = vmatprep.subr.mxu1 %v2753_v3 }
 0x37d   :  { %2302 = vmatpush3.msra.mxu1 %v2928_v20 }
 0x37e   :  { %2303 = vmatprep.subr.mxu1 %v2753_v3 }
 0x37f   :  { %2304 = vmatpush3.msra.mxu1 %v2937_v21 }
 0x380   :  { %2305 = vmatprep.subr.mxu1 %v2753_v3 }
 0x381   :  { %2306 = vmatpush3.msra.mxu1 %v2946_v22 }
 0x382   :  { %2307 = vmatprep.subr.mxu1 %v2753_v3 }
 0x383   :  { %2308 = vmatpush3.msra.mxu1 %v2955_v23 }
 0x384   :  { %2309 = vmatprep.subr.mxu1 %v2753_v3 }
 0x385   :  { %2310 = vmatpush3.msra.mxu1 %v2964_v24 }
 0x386   :  { %2311 = vmatprep.subr.mxu1 %v2753_v3 }
 0x387   :  { %2312 = vmatpush3.msra.mxu1 %v2973_v25 }
 0x388   :  { %2351 = vmatprep.subr.mxu1 %v836_v63 }
 0x428   :  { %v580_v59 = vpop.f32.mrf.mxu1 }
 0x429   :  { %v584_v60 = vadd.f32 %v580_v59, %v3034_v37 }
 0x42a   :  { %v2245_v61 = vpop.f32.mrf.mxu1 }
 0x42b   :  { %2729 = vtanh.f32 %v584_v60 }
 0x438   :  { %v3190_v62 = vpop.eup %2729 }
 0x439   :  { %2279 = vmatmul.mubr.f32.vlgmr.msra.gmra.mxu0 %v3190_v62 }
 0x43a   :  { %2317 = vmatpush3.msra.mxu0 %v2821_v4  ;;  %2348 = vmatprep.mubr.msk.f32.mxu0 %vm2754_vm2, %v2753_v3 }
 0x43b   :  { %2318 = vmatprep.subr.mxu0 %v2753_v3 }
 0x43c   :  { %2319 = vmatpush3.msra.mxu0 %v2829_v5  ;;  %v835_v5 = vld [vmem:[%s3770_s4 + $0x70] sm:$0xff] }
 0x43d   :  { %2320 = vmatprep.subr.mxu0 %v2753_v3 }
 0x43e   :  { %2321 = vmatpush3.msra.mxu0 %v2843_v8  ;;  %v832_v8 = vld [vmem:[%s3770_s4 + $0x58] sm:$0xff] }
 0x43f   :  { %2322 = vmatprep.subr.mxu0 %v2753_v3 }
 0x440   :  { %2323 = vmatpush3.msra.mxu0 %v2855_v10  ;;  %v830_v10 = vld [vmem:[%s3770_s4 + $0x48] sm:$0xff] }
 0x441   :  { %2324 = vmatprep.subr.mxu0 %v2753_v3 }
 0x442   :  { %2325 = vmatpush3.msra.mxu0 %v2867_v12  ;;  %v828_v12 = vld [vmem:[%s3770_s4 + $0x38] sm:$0xff] }
 0x443   :  { %2326 = vmatprep.subr.mxu0 %v2753_v3 }
 0x444   :  { %2327 = vmatpush3.msra.mxu0 %v2879_v14  ;;  %v826_v14 = vld [vmem:[%s3770_s4 + $0x28] sm:$0xff] }
 0x445   :  { %2328 = vmatprep.subr.mxu0 %v2753_v3 }
 0x446   :  { %2329 = vmatpush3.msra.mxu0 %v2891_v16  ;;  %v824_v16 = vld [vmem:[%s3770_s4 + $0x18] sm:$0xff] }
 0x447   :  { %2330 = vmatprep.subr.mxu0 %v2753_v3 }
 0x448   :  { %2331 = vmatpush3.msra.mxu0 %v2900_v17  ;;  %v823_v17 = vld [vmem:[%s3770_s4 + $0x10] sm:$0xff] }
 0x449   :  { %2332 = vmatprep.subr.mxu0 %v2753_v3 }
 0x44a   :  { %2333 = vmatpush3.msra.mxu0 %v2910_v18  ;;  %v822_v18 = vld [vmem:[%s3770_s4 + $0x8] sm:$0xff] }
 0x44b   :  { %2334 = vmatprep.subr.mxu0 %v2753_v3 }
 0x44c   :  { %2335 = vmatpush3.msra.mxu0 %v2919_v19  ;;  %v821_v19 = vld [vmem:[%s3770_s4] sm:$0xff] }
 0x44d   :  { %2336 = vmatprep.subr.mxu0 %v2753_v3 }
 0x44e   :  { %2337 = vmatpush3.msra.mxu0 %v2928_v20  ;;  %v3285_v20 = vld [vmem:[%s3771_s5 + $0x78] sm:$0xff] }
 0x44f   :  { %2338 = vmatprep.subr.mxu0 %v2753_v3 }
 0x450   :  { %2339 = vmatpush3.msra.mxu0 %v2937_v21  ;;  %v3291_v21 = vld [vmem:[%s3771_s5 + $0x70] sm:$0xff] }
 0x451   :  { %2340 = vmatprep.subr.mxu0 %v2753_v3 }
 0x452   :  { %2341 = vmatpush3.msra.mxu0 %v2946_v22  ;;  %v3298_v22 = vld [vmem:[%s3771_s5 + $0x68] sm:$0xff] }
 0x453   :  { %2342 = vmatprep.subr.mxu0 %v2753_v3 }
 0x454   :  { %2343 = vmatpush3.msra.mxu0 %v2955_v23  ;;  %v3305_v23 = vld [vmem:[%s3771_s5 + $0x60] sm:$0xff] }
 0x455   :  { %2344 = vmatprep.subr.mxu0 %v2753_v3 }
 0x456   :  { %2345 = vmatpush3.msra.mxu0 %v2964_v24  ;;  %v3312_v24 = vld [vmem:[%s3771_s5 + $0x58] sm:$0xff] }
 0x457   :  { %2346 = vmatprep.subr.mxu0 %v2753_v3 }
 0x458   :  { %2347 = vmatpush3.msra.mxu0 %v2973_v25  ;;  %v3319_v25 = vld [vmem:[%s3771_s5 + $0x50] sm:$0xff] }
 0x459   :  { %2395 = vmatprep.subr.mxu0 %v2753_v3 }
 0x4f9   :  { %v655_v0 = vpop.f32.mrf.mxu0 }
 0x4fa   :  { %v659_v1 = vadd.f32 %v655_v0, %v3032_v35  ;;  %v3389_v35 = vld [vmem:[%s3771_s5] sm:$0xff] }
 0x4fb   :  { %v2280_v2 = vpop.f32.mrf.mxu0 }
 0x4fc   :  { %2731 = vtanh.f32 %v659_v1 }
 0x509   :  { %v2732_v4 = vpop.eup %2731 }
 0x50a   :  { %2314 = vmatmul.mubr.f32.vlgmr.msra.gmra.mxu1 %v2732_v4 }
 0x50b   :  { %2352 = vmatpush3.msra.mxu1 %v836_v63  ;;  %2383 = vmatprep.mubr.f32.mxu1 %v3040_v46 }
 0x50c   :  { %2353 = vmatprep.subr.mxu1 %v835_v5 }
 0x50d   :  { %2354 = vmatpush3.msra.mxu1 %v835_v5 }
 0x50e   :  { %2355 = vmatprep.subr.mxu1 %v834_v6 }
 0x50f   :  { %2356 = vmatpush3.msra.mxu1 %v834_v6 }
 0x510   :  { %2357 = vmatprep.subr.mxu1 %v833_v7 }
 0x511   :  { %2358 = vmatpush3.msra.mxu1 %v833_v7 }
 0x512   :  { %2359 = vmatprep.subr.mxu1 %v832_v8 }
 0x513   :  { %2360 = vmatpush3.msra.mxu1 %v832_v8 }
 0x514   :  { %2361 = vmatprep.subr.mxu1 %v831_v9 }
 0x515   :  { %2362 = vmatpush3.msra.mxu1 %v831_v9 }
 0x516   :  { %2363 = vmatprep.subr.mxu1 %v830_v10 }
 0x517   :  { %2364 = vmatpush3.msra.mxu1 %v830_v10 }
 0x518   :  { %2365 = vmatprep.subr.mxu1 %v829_v11 }
 0x519   :  { %2366 = vmatpush3.msra.mxu1 %v829_v11 }
 0x51a   :  { %2367 = vmatprep.subr.mxu1 %v828_v12 }
 0x51b   :  { %2368 = vmatpush3.msra.mxu1 %v828_v12 }
 0x51c   :  { %2369 = vmatprep.subr.mxu1 %v827_v13 }
 0x51d   :  { %2370 = vmatpush3.msra.mxu1 %v827_v13 }
 0x51e   :  { %2371 = vmatprep.subr.mxu1 %v826_v14 }
 0x51f   :  { %2372 = vmatpush3.msra.mxu1 %v826_v14 }
 0x520   :  { %2373 = vmatprep.subr.mxu1 %v825_v15 }
 0x521   :  { %2374 = vmatpush3.msra.mxu1 %v825_v15  ;;  %v1591_v15 = vld [vmem:[%s3773_s7 + $0x78] sm:$0xff] }
 0x522   :  { %2375 = vmatprep.subr.mxu1 %v824_v16 }
 0x523   :  { %2376 = vmatpush3.msra.mxu1 %v824_v16 }
 0x524   :  { %2377 = vmatprep.subr.mxu1 %v823_v17 }
 0x525   :  { %2378 = vmatpush3.msra.mxu1 %v823_v17 }
 0x526   :  { %2379 = vmatprep.subr.mxu1 %v822_v18 }
 0x527   :  { %2380 = vmatpush3.msra.mxu1 %v822_v18 }
 0x528   :  { %2381 = vmatprep.subr.mxu1 %v821_v19 }
 0x529   :  { %2382 = vmatpush3.msra.mxu1 %v821_v19 }
 0x52a   :  { %2384 = vmatmul.mubr.f32.vlgmr.msra.gmra.mxu1 %v3077_v50  ;;  %2430 = vmatprep.subr.mxu1 %v2753_v3 }
 0x52b   :  { %2386 = vmatprep.mubr.f32.mxu1 %v3115_v54  ;;  %2431 = vmatpush3.msra.mxu1 %v3285_v20 }
 0x52c   :  { %2432 = vmatprep.subr.mxu1 %v2753_v3 }
 0x52d   :  { %2433 = vmatpush3.msra.mxu1 %v3291_v21 }
 0x52e   :  { %2387 = vmatmul.mubr.f32.gmra.mxu1 %v3153_v58  ;;  %2434 = vmatprep.subr.mxu1 %v2753_v3 }
 0x52f   :  { %2389 = vmatprep.mubr.f32.mxu1 %v3190_v62  ;;  %2435 = vmatpush3.msra.mxu1 %v3298_v22 }
 0x530   :  { %2436 = vmatprep.subr.mxu1 %v2753_v3 }
 0x531   :  { %2437 = vmatpush3.msra.mxu1 %v3305_v23 }
 0x532   :  { %2390 = vmatmul.mubr.f32.gmra.mxu1 %v2732_v4  ;;  %2438 = vmatprep.subr.mxu1 %v2753_v3 }
 0x533   :  { %2439 = vmatpush3.msra.mxu1 %v3312_v24 }
 0x534   :  { %2440 = vmatprep.subr.mxu1 %v2753_v3 }
 0x535   :  { %2441 = vmatpush3.msra.mxu1 %v3319_v25 }
 0x536   :  { %2442 = vmatprep.subr.mxu1 %v2753_v3 }
 0x537   :  { %2443 = vmatpush3.msra.mxu1 %v3326_v26 }
 0x538   :  { %2444 = vmatprep.subr.mxu1 %v2753_v3 }
 0x539   :  { %2445 = vmatpush3.msra.mxu1 %v3333_v27 }
 0x53a   :  { %2446 = vmatprep.subr.mxu1 %v2753_v3 }
 0x53b   :  { %2447 = vmatpush3.msra.mxu1 %v3340_v28 }
 0x53c   :  { %2448 = vmatprep.subr.mxu1 %v2753_v3 }
 0x53d   :  { %2449 = vmatpush3.msra.mxu1 %v3347_v29 }
 0x53e   :  { %2450 = vmatprep.subr.mxu1 %v2753_v3 }
 0x53f   :  { %2451 = vmatpush3.msra.mxu1 %v3354_v30 }
 0x540   :  { %2452 = vmatprep.subr.mxu1 %v2753_v3 }
 0x541   :  { %2453 = vmatpush3.msra.mxu1 %v3361_v31 }
 0x542   :  { %2454 = vmatprep.subr.mxu1 %v2753_v3 }
 0x543   :  { %2455 = vmatpush3.msra.mxu1 %v3368_v32 }
 0x544   :  { %2456 = vmatprep.subr.mxu1 %v2753_v3 }
 0x545   :  { %2457 = vmatpush3.msra.mxu1 %v3375_v33 }
 0x546   :  { %2458 = vmatprep.subr.mxu1 %v2753_v3 }
 0x547   :  { %2459 = vmatpush3.msra.mxu1 %v3382_v34 }
 0x548   :  { %2460 = vmatprep.subr.mxu1 %v2753_v3 }
 0x549   :  { %2461 = vmatpush3.msra.mxu1 %v3389_v35 }
 0x54a   :  { %2500 = vmatprep.subr.mxu1 %v2753_v3 }
 0x5ca   :  { %v730_v36 = vpop.f32.mrf.mxu1 }
 0x5cb   :  { %v734_v37 = vadd.f32 %v730_v36, %v3038_v41 }
 0x5cc   :  { %v2315_v38 = vpop.f32.mrf.mxu1 }
 0x5cd   :  { %2733 = vtanh.f32 %v734_v37 }
 0x5da   :  { %v2734_v40 = vpop.eup %2733 }
 0x5db   :  { %2349 = vmatmul.mubr.f32.vlgmr.msra.gmra.mxu0 %v2734_v40  ;;  %2392 = vmatprep.mubr.f32.mxu1 %v2734_v40 }
 0x5dc   :  { %2396 = vmatpush3.msra.mxu0 %v3285_v20  ;;  %2427 = vmatprep.mubr.msk.f32.mxu0 %vm2754_vm2, %v2753_v3 }
 0x5dd   :  { %2397 = vmatprep.subr.mxu0 %v2753_v3 }
 0x5de   :  { %2398 = vmatpush3.msra.mxu0 %v3291_v21 }
 0x5df   :  { %2399 = vmatprep.subr.mxu0 %v2753_v3 }
 0x5e0   :  { %2400 = vmatpush3.msra.mxu0 %v3298_v22 }
 0x5e1   :  { %2401 = vmatprep.subr.mxu0 %v2753_v3 }
 0x5e2   :  { %2402 = vmatpush3.msra.mxu0 %v3305_v23 }
 0x5e3   :  { %2403 = vmatprep.subr.mxu0 %v2753_v3 }
 0x5e4   :  { %2404 = vmatpush3.msra.mxu0 %v3312_v24 }
 0x5e5   :  { %2405 = vmatprep.subr.mxu0 %v2753_v3 }
 0x5e6   :  { %2406 = vmatpush3.msra.mxu0 %v3319_v25 }
 0x5e7   :  { %2407 = vmatprep.subr.mxu0 %v2753_v3 }
 0x5e8   :  { %2408 = vmatpush3.msra.mxu0 %v3326_v26 }
 0x5e9   :  { %2409 = vmatprep.subr.mxu0 %v2753_v3 }
 0x5ea   :  { %2410 = vmatpush3.msra.mxu0 %v3333_v27  ;;  %v2385_v45 = vpop.f32.mrf.mxu1 }
 0x5eb   :  { %2411 = vmatprep.subr.mxu0 %v2753_v3  ;;  %v932_v58 = vadd.f32 %v2385_v45, %v3470_v47 }
 0x5ec   :  { %2412 = vmatpush3.msra.mxu0 %v3340_v28  ;;  %v926_v46 = vpop.f32.mrf.mxu1 }
 0x5ed   :  { %2413 = vmatprep.subr.mxu0 %v2753_v3  ;;  %v927_v48 = vadd.f32 %v3470_v47, %v926_v46 }
 0x5ee   :  { %2414 = vmatpush3.msra.mxu0 %v3347_v29  ;;  %v3510_v52 = vpop.f32.mrf.mxu1 }
 0x5ef   :  { %2415 = vmatprep.subr.mxu0 %v2753_v3  ;;  %v942_v5 = vadd.f32 %v3510_v52, %v3470_v47 }
 0x5f0   :  { %2416 = vmatpush3.msra.mxu0 %v3354_v30  ;;  %v936_v53 = vpop.f32.mrf.mxu1 }
 0x5f1   :  { %2417 = vmatprep.subr.mxu0 %v2753_v3  ;;  %v937_v63 = vadd.f32 %v3470_v47, %v936_v53 }
 0x5f2   :  { %2418 = vmatpush3.msra.mxu0 %v3361_v31  ;;  %v3512_v54 = vpop.f32.mrf.mxu1 }
 0x5f3   :  { %2419 = vmatprep.subr.mxu0 %v2753_v3  ;;  %v952_v16 = vadd.f32 %v3512_v54, %v3470_v47 }
 0x5f4   :  { %2420 = vmatpush3.msra.mxu0 %v3368_v32  ;;  %v3514_v55 = vpop.f32.mrf.mxu1 }
 0x5f5   :  { %2421 = vmatprep.subr.mxu0 %v2753_v3  ;;  %v947_v10 = vadd.f32 %v3470_v47, %v3514_v55 }
 0x5f6   :  { %2422 = vmatpush3.msra.mxu0 %v3375_v33 }
 0x5f7   :  { %2423 = vmatprep.subr.mxu0 %v2753_v3 }
 0x5f8   :  { %2424 = vmatpush3.msra.mxu0 %v3382_v34 }
 0x5f9   :  { %2425 = vmatprep.subr.mxu0 %v2753_v3 }
 0x5fa   :  { %2426 = vmatpush3.msra.mxu0 %v3389_v35 }
 0x5fb   :  { %2428 = vmatmul.mubr.f32.vlgmr.msra.gmra.mxu0 %v2753_v3  ;;  %2465 = vmatprep.subr.mxu0 %v2753_v3 }
 0x5fc   :  { %2466 = vmatpush3.msra.mxu0 %v3285_v20  ;;  %2497 = vmatprep.mubr.msk.f32.mxu0 %vm2754_vm2, %v2753_v3 }
 0x5fd   :  { %2467 = vmatprep.subr.mxu0 %v2753_v3 }
 0x5fe   :  { %2468 = vmatpush3.msra.mxu0 %v3291_v21 }
 0x5ff   :  { %2469 = vmatprep.subr.mxu0 %v2753_v3 }
 0x600   :  { %2470 = vmatpush3.msra.mxu0 %v3298_v22 }
 0x601   :  { %2471 = vmatprep.subr.mxu0 %v2753_v3 }
 0x602   :  { %2472 = vmatpush3.msra.mxu0 %v3305_v23 }
 0x603   :  { %2473 = vmatprep.subr.mxu0 %v2753_v3 }
 0x604   :  { %2474 = vmatpush3.msra.mxu0 %v3312_v24 }
 0x605   :  { %2475 = vmatprep.subr.mxu0 %v2753_v3 }
 0x606   :  { %2476 = vmatpush3.msra.mxu0 %v3319_v25 }
 0x607   :  { %2477 = vmatprep.subr.mxu0 %v2753_v3 }
 0x608   :  { %2478 = vmatpush3.msra.mxu0 %v3326_v26 }
 0x609   :  { %2479 = vmatprep.subr.mxu0 %v2753_v3 }
 0x60a   :  { %2480 = vmatpush3.msra.mxu0 %v3333_v27 }
 0x60b   :  { %2481 = vmatprep.subr.mxu0 %v2753_v3 }
 0x60c   :  { %2482 = vmatpush3.msra.mxu0 %v3340_v28 }
 0x60d   :  { %2483 = vmatprep.subr.mxu0 %v2753_v3 }
 0x60e   :  { %2484 = vmatpush3.msra.mxu0 %v3347_v29 }
 0x60f   :  { %2485 = vmatprep.subr.mxu0 %v2753_v3 }
 0x610   :  { %2486 = vmatpush3.msra.mxu0 %v3354_v30 }
 0x611   :  { %2487 = vmatprep.subr.mxu0 %v2753_v3 }
 0x612   :  { %2488 = vmatpush3.msra.mxu0 %v3361_v31 }
 0x613   :  { %2489 = vmatprep.subr.mxu0 %v2753_v3 }
 0x614   :  { %2490 = vmatpush3.msra.mxu0 %v3368_v32 }
 0x615   :  { %2491 = vmatprep.subr.mxu0 %v2753_v3 }
 0x616   :  { %2492 = vmatpush3.msra.mxu0 %v3375_v33 }
 0x617   :  { %2493 = vmatprep.subr.mxu0 %v2753_v3 }
 0x618   :  { %2494 = vmatpush3.msra.mxu0 %v3382_v34 }
 0x619   :  { %2495 = vmatprep.subr.mxu0 %v2753_v3 }
 0x61a   :  { %2496 = vmatpush3.msra.mxu0 %v3389_v35 }
 0x61b   :  { %2535 = vmatprep.subr.mxu0 %v2753_v3 }
 0x69b   :  { %v805_v41 = vpop.f32.mrf.mxu0 }
 0x69c   :  { %v809_v42 = vadd.f32 %v805_v41, %v3036_v39  ;;  %v1727_v41 = vld [vmem:[%s3774_s8] ss:$0 sm:$0xff] }
 0x69d   :  { %v2350_v43 = vpop.f32.mrf.mxu0 }
 0x69e   :  { %2735 = vtanh.f32 %v809_v42 }
 0x6ab   :  { %v2736_v44 = vpop.eup %2735 }
 0x6ac   :  { %2393 = vmatmul.mubr.f32.gmra.mxu1 %v2736_v44 }
 0x6ad   :  { %2462 = vmatprep.mubr.msk.f32.mxu1 %vm2754_vm2, %v2753_v3 }
 0x6bb   :  { %v1042_v49 = vpop.f32.mrf.mxu0 }
 0x6bc   :  { %v1046_v50 = vadd.f32 %v1042_v49, %v927_v48 }
 0x6bd   :  { %v2429_v51 = vpop.f32.mrf.mxu0 }
 0x6be   :  { %2737 = vtanh.f32 %v1046_v50 }
 0x6cb   :  { %v3473_v39 = vpop.eup %2737 }
 0x6cc   :  { %2463 = vmatmul.mubr.f32.vlgmr.msra.gmra.mxu1 %v3473_v39 }
 0x6cd   :  { %2501 = vmatpush3.msra.mxu1 %v3285_v20  ;;  %2532 = vmatprep.mubr.msk.f32.mxu1 %vm2754_vm2, %v2753_v3 }
 0x6ce   :  { %2502 = vmatprep.subr.mxu1 %v2753_v3 }
 0x6cf   :  { %2503 = vmatpush3.msra.mxu1 %v3291_v21 }
 0x6d0   :  { %2504 = vmatprep.subr.mxu1 %v2753_v3 }
 0x6d1   :  { %2505 = vmatpush3.msra.mxu1 %v3298_v22 }
 0x6d2   :  { %2506 = vmatprep.subr.mxu1 %v2753_v3 }
 0x6d3   :  { %2507 = vmatpush3.msra.mxu1 %v3305_v23 }
 0x6d4   :  { %2508 = vmatprep.subr.mxu1 %v2753_v3 }
 0x6d5   :  { %2509 = vmatpush3.msra.mxu1 %v3312_v24 }
 0x6d6   :  { %2510 = vmatprep.subr.mxu1 %v2753_v3 }
 0x6d7   :  { %2511 = vmatpush3.msra.mxu1 %v3319_v25 }
 0x6d8   :  { %2512 = vmatprep.subr.mxu1 %v2753_v3 }
 0x6d9   :  { %2513 = vmatpush3.msra.mxu1 %v3326_v26 }
 0x6da   :  { %2514 = vmatprep.subr.mxu1 %v2753_v3 }
 0x6db   :  { %2515 = vmatpush3.msra.mxu1 %v3333_v27 }
 0x6dc   :  { %2516 = vmatprep.subr.mxu1 %v2753_v3 }
 0x6dd   :  { %2517 = vmatpush3.msra.mxu1 %v3340_v28 }
 0x6de   :  { %2518 = vmatprep.subr.mxu1 %v2753_v3 }
 0x6df   :  { %2519 = vmatpush3.msra.mxu1 %v3347_v29 }
 0x6e0   :  { %2520 = vmatprep.subr.mxu1 %v2753_v3 }
 0x6e1   :  { %2521 = vmatpush3.msra.mxu1 %v3354_v30 }
 0x6e2   :  { %2522 = vmatprep.subr.mxu1 %v2753_v3 }
 0x6e3   :  { %2523 = vmatpush3.msra.mxu1 %v3361_v31 }
 0x6e4   :  { %2524 = vmatprep.subr.mxu1 %v2753_v3 }
 0x6e5   :  { %2525 = vmatpush3.msra.mxu1 %v3368_v32 }
 0x6e6   :  { %2526 = vmatprep.subr.mxu1 %v2753_v3 }
 0x6e7   :  { %2527 = vmatpush3.msra.mxu1 %v3375_v33 }
 0x6e8   :  { %2528 = vmatprep.subr.mxu1 %v2753_v3 }
 0x6e9   :  { %2529 = vmatpush3.msra.mxu1 %v3382_v34 }
 0x6ea   :  { %2530 = vmatprep.subr.mxu1 %v2753_v3 }
 0x6eb   :  { %2531 = vmatpush3.msra.mxu1 %v3389_v35 }
 0x6ec   :  { %2570 = vmatprep.subr.mxu1 %v2753_v3 }
 0x76c   :  { %v3516_v56 = vpop.f32.mrf.mxu1 }
 0x76d   :  { %v962_v54 = vadd.f32 %v3516_v56, %v3470_v47 }
 0x76e   :  { %v3518_v57 = vpop.f32.mrf.mxu1 }
 0x78c   :  { %v1116_v59 = vpop.f32.mrf.mxu1 }
 0x78d   :  { %v1120_v60 = vadd.f32 %v1116_v59, %v932_v58 }
 0x78e   :  { %v2464_v61 = vpop.f32.mrf.mxu1 }
 0x78f   :  { %2739 = vtanh.f32 %v1120_v60 }
 0x79c   :  { %v3521_v62 = vpop.eup %2739 }
 0x79d   :  { %2498 = vmatmul.mubr.f32.vlgmr.msra.gmra.mxu0 %v3521_v62 }
 0x79e   :  { %2536 = vmatpush3.msra.mxu0 %v3285_v20  ;;  %2567 = vmatprep.mubr.msk.f32.mxu0 %vm2754_vm2, %v2753_v3 }
 0x79f   :  { %2537 = vmatprep.subr.mxu0 %v2753_v3 }
 0x7a0   :  { %2538 = vmatpush3.msra.mxu0 %v3291_v21 }
 0x7a1   :  { %2539 = vmatprep.subr.mxu0 %v2753_v3 }
 0x7a2   :  { %2540 = vmatpush3.msra.mxu0 %v3298_v22 }
 0x7a3   :  { %2541 = vmatprep.subr.mxu0 %v2753_v3 }
 0x7a4   :  { %2542 = vmatpush3.msra.mxu0 %v3305_v23 }
 0x7a5   :  { %2543 = vmatprep.subr.mxu0 %v2753_v3 }
 0x7a6   :  { %2544 = vmatpush3.msra.mxu0 %v3312_v24 }
 0x7a7   :  { %2545 = vmatprep.subr.mxu0 %v2753_v3 }
 0x7a8   :  { %2546 = vmatpush3.msra.mxu0 %v3319_v25 }
 0x7a9   :  { %2547 = vmatprep.subr.mxu0 %v2753_v3 }
 0x7aa   :  { %2548 = vmatpush3.msra.mxu0 %v3326_v26 }
 0x7ab   :  { %2549 = vmatprep.subr.mxu0 %v2753_v3 }
 0x7ac   :  { %2550 = vmatpush3.msra.mxu0 %v3333_v27 }
 0x7ad   :  { %2551 = vmatprep.subr.mxu0 %v2753_v3 }
 0x7ae   :  { %2552 = vmatpush3.msra.mxu0 %v3340_v28 }
 0x7af   :  { %2553 = vmatprep.subr.mxu0 %v2753_v3 }
 0x7b0   :  { %2554 = vmatpush3.msra.mxu0 %v3347_v29 }
 0x7b1   :  { %2555 = vmatprep.subr.mxu0 %v2753_v3 }
 0x7b2   :  { %2556 = vmatpush3.msra.mxu0 %v3354_v30 }
 0x7b3   :  { %2557 = vmatprep.subr.mxu0 %v2753_v3 }
 0x7b4   :  { %2558 = vmatpush3.msra.mxu0 %v3361_v31 }
 0x7b5   :  { %2559 = vmatprep.subr.mxu0 %v2753_v3 }
 0x7b6   :  { %2560 = vmatpush3.msra.mxu0 %v3368_v32 }
 0x7b7   :  { %2561 = vmatprep.subr.mxu0 %v2753_v3 }
 0x7b8   :  { %2562 = vmatpush3.msra.mxu0 %v3375_v33 }
 0x7b9   :  { %2563 = vmatprep.subr.mxu0 %v2753_v3 }
 0x7ba   :  { %2564 = vmatpush3.msra.mxu0 %v3382_v34 }
 0x7bb   :  { %2565 = vmatprep.subr.mxu0 %v2753_v3 }
 0x7bc   :  { %2566 = vmatpush3.msra.mxu0 %v3389_v35 }
 0x7bd   :  { %2605 = vmatprep.subr.mxu0 %v2753_v3 }
 0x85d   :  { %v1190_v0 = vpop.f32.mrf.mxu0 }
 0x85e   :  { %v1194_v1 = vadd.f32 %v1190_v0, %v937_v63 }
 0x85f   :  { %v2499_v2 = vpop.f32.mrf.mxu0 }
 0x860   :  { %2741 = vtanh.f32 %v1194_v1 }
 0x86d   :  { %v3559_v4 = vpop.eup %2741 }
 0x86e   :  { %2533 = vmatmul.mubr.f32.vlgmr.msra.gmra.mxu1 %v3559_v4 }
 0x86f   :  { %2571 = vmatpush3.msra.mxu1 %v3285_v20  ;;  %2602 = vmatprep.mubr.msk.f32.mxu1 %vm2754_vm2, %v2753_v3 }
 0x870   :  { %2572 = vmatprep.subr.mxu1 %v2753_v3 }
 0x871   :  { %2573 = vmatpush3.msra.mxu1 %v3291_v21 }
 0x872   :  { %2574 = vmatprep.subr.mxu1 %v2753_v3 }
 0x873   :  { %2575 = vmatpush3.msra.mxu1 %v3298_v22 }
 0x874   :  { %2576 = vmatprep.subr.mxu1 %v2753_v3 }
 0x875   :  { %2577 = vmatpush3.msra.mxu1 %v3305_v23 }
 0x876   :  { %2578 = vmatprep.subr.mxu1 %v2753_v3 }
 0x877   :  { %2579 = vmatpush3.msra.mxu1 %v3312_v24 }
 0x878   :  { %2580 = vmatprep.subr.mxu1 %v2753_v3 }
 0x879   :  { %2581 = vmatpush3.msra.mxu1 %v3319_v25 }
 0x87a   :  { %2582 = vmatprep.subr.mxu1 %v2753_v3 }
 0x87b   :  { %2583 = vmatpush3.msra.mxu1 %v3326_v26 }
 0x87c   :  { %2584 = vmatprep.subr.mxu1 %v2753_v3 }
 0x87d   :  { %2585 = vmatpush3.msra.mxu1 %v3333_v27 }
 0x87e   :  { %2586 = vmatprep.subr.mxu1 %v2753_v3 }
 0x87f   :  { %2587 = vmatpush3.msra.mxu1 %v3340_v28 }
 0x880   :  { %2588 = vmatprep.subr.mxu1 %v2753_v3 }
 0x881   :  { %2589 = vmatpush3.msra.mxu1 %v3347_v29 }
 0x882   :  { %2590 = vmatprep.subr.mxu1 %v2753_v3 }
 0x883   :  { %2591 = vmatpush3.msra.mxu1 %v3354_v30 }
 0x884   :  { %2592 = vmatprep.subr.mxu1 %v2753_v3 }
 0x885   :  { %2593 = vmatpush3.msra.mxu1 %v3361_v31 }
 0x886   :  { %2594 = vmatprep.subr.mxu1 %v2753_v3 }
 0x887   :  { %2595 = vmatpush3.msra.mxu1 %v3368_v32 }
 0x888   :  { %2596 = vmatprep.subr.mxu1 %v2753_v3 }
 0x889   :  { %2597 = vmatpush3.msra.mxu1 %v3375_v33 }
 0x88a   :  { %2598 = vmatprep.subr.mxu1 %v2753_v3 }
 0x88b   :  { %2599 = vmatpush3.msra.mxu1 %v3382_v34 }
 0x88c   :  { %2600 = vmatprep.subr.mxu1 %v2753_v3 }
 0x88d   :  { %2601 = vmatpush3.msra.mxu1 %v3389_v35 }
 0x88e   :  { %2640 = vmatprep.subr.mxu1 %v2753_v3 }
 0x92e   :  { %v1264_v6 = vpop.f32.mrf.mxu1 }
 0x92f   :  { %v1268_v7 = vadd.f32 %v1264_v6, %v942_v5 }
 0x930   :  { %v2534_v8 = vpop.f32.mrf.mxu1 }
 0x931   :  { %2743 = vtanh.f32 %v1268_v7 }
 0x93e   :  { %v3598_v9 = vpop.eup %2743 }
 0x93f   :  { %2568 = vmatmul.mubr.f32.vlgmr.msra.gmra.mxu0 %v3598_v9 }
 0x940   :  { %2606 = vmatpush3.msra.mxu0 %v3285_v20  ;;  %2637 = vmatprep.mubr.msk.f32.mxu0 %vm2754_vm2, %v2753_v3 }
 0x941   :  { %2607 = vmatprep.subr.mxu0 %v2753_v3 }
 0x942   :  { %2608 = vmatpush3.msra.mxu0 %v3291_v21 }
 0x943   :  { %2609 = vmatprep.subr.mxu0 %v2753_v3 }
 0x944   :  { %2610 = vmatpush3.msra.mxu0 %v3298_v22 }
 0x945   :  { %2611 = vmatprep.subr.mxu0 %v2753_v3 }
 0x946   :  { %2612 = vmatpush3.msra.mxu0 %v3305_v23 }
 0x947   :  { %2613 = vmatprep.subr.mxu0 %v2753_v3 }
 0x948   :  { %2614 = vmatpush3.msra.mxu0 %v3312_v24 }
 0x949   :  { %2615 = vmatprep.subr.mxu0 %v2753_v3 }
 0x94a   :  { %2616 = vmatpush3.msra.mxu0 %v3319_v25 }
 0x94b   :  { %2617 = vmatprep.subr.mxu0 %v2753_v3 }
 0x94c   :  { %2618 = vmatpush3.msra.mxu0 %v3326_v26 }
 0x94d   :  { %2619 = vmatprep.subr.mxu0 %v2753_v3 }
 0x94e   :  { %2620 = vmatpush3.msra.mxu0 %v3333_v27 }
 0x94f   :  { %2621 = vmatprep.subr.mxu0 %v2753_v3 }
 0x950   :  { %2622 = vmatpush3.msra.mxu0 %v3340_v28 }
 0x951   :  { %2623 = vmatprep.subr.mxu0 %v2753_v3 }
 0x952   :  { %2624 = vmatpush3.msra.mxu0 %v3347_v29 }
 0x953   :  { %2625 = vmatprep.subr.mxu0 %v2753_v3 }
 0x954   :  { %2626 = vmatpush3.msra.mxu0 %v3354_v30 }
 0x955   :  { %2627 = vmatprep.subr.mxu0 %v2753_v3 }
 0x956   :  { %2628 = vmatpush3.msra.mxu0 %v3361_v31 }
 0x957   :  { %2629 = vmatprep.subr.mxu0 %v2753_v3 }
 0x958   :  { %2630 = vmatpush3.msra.mxu0 %v3368_v32 }
 0x959   :  { %2631 = vmatprep.subr.mxu0 %v2753_v3 }
 0x95a   :  { %2632 = vmatpush3.msra.mxu0 %v3375_v33 }
 0x95b   :  { %2633 = vmatprep.subr.mxu0 %v2753_v3 }
 0x95c   :  { %2634 = vmatpush3.msra.mxu0 %v3382_v34 }
 0x95d   :  { %2635 = vmatprep.subr.mxu0 %v2753_v3 }
 0x95e   :  { %2636 = vmatpush3.msra.mxu0 %v3389_v35 }
 0x95f   :  { %2675 = vmatprep.subr.mxu0 %v1591_v15 }
 0x9ff   :  { %v1338_v11 = vpop.f32.mrf.mxu0 }
 0xa00   :  { %v1342_v12 = vadd.f32 %v1338_v11, %v947_v10 }
 0xa01   :  { %v2569_v13 = vpop.f32.mrf.mxu0 }
 0xa02   :  { %2745 = vtanh.f32 %v1342_v12 }
 0xa0f   :  { %v3636_v14 = vpop.eup %2745 }
 0xa10   :  { %2603 = vmatmul.mubr.f32.vlgmr.msra.gmra.mxu1 %v3636_v14 }
 0xa11   :  { %2641 = vmatpush3.msra.mxu1 %v3285_v20  ;;  %2672 = vmatprep.mubr.msk.f32.mxu1 %vm2754_vm2, %v2753_v3 }
 0xa12   :  { %2642 = vmatprep.subr.mxu1 %v2753_v3 }
 0xa13   :  { %2643 = vmatpush3.msra.mxu1 %v3291_v21  ;;  %v1590_v21 = vld [vmem:[%s3773_s7 + $0x70] sm:$0xff] }
 0xa14   :  { %2644 = vmatprep.subr.mxu1 %v2753_v3 }
 0xa15   :  { %2645 = vmatpush3.msra.mxu1 %v3298_v22  ;;  %v1588_v22 = vld [vmem:[%s3773_s7 + $0x60] sm:$0xff] }
 0xa16   :  { %2646 = vmatprep.subr.mxu1 %v2753_v3 }
 0xa17   :  { %2647 = vmatpush3.msra.mxu1 %v3305_v23  ;;  %v1587_v23 = vld [vmem:[%s3773_s7 + $0x58] sm:$0xff] }
 0xa18   :  { %2648 = vmatprep.subr.mxu1 %v2753_v3 }
 0xa19   :  { %2649 = vmatpush3.msra.mxu1 %v3312_v24  ;;  %v1586_v24 = vld [vmem:[%s3773_s7 + $0x50] sm:$0xff] }
 0xa1a   :  { %2650 = vmatprep.subr.mxu1 %v2753_v3 }
 0xa1b   :  { %2651 = vmatpush3.msra.mxu1 %v3319_v25  ;;  %v1585_v25 = vld [vmem:[%s3773_s7 + $0x48] sm:$0xff] }
 0xa1c   :  { %2652 = vmatprep.subr.mxu1 %v2753_v3 }
 0xa1d   :  { %2653 = vmatpush3.msra.mxu1 %v3326_v26  ;;  %v1584_v26 = vld [vmem:[%s3773_s7 + $0x40] sm:$0xff] }
 0xa1e   :  { %2654 = vmatprep.subr.mxu1 %v2753_v3 }
 0xa1f   :  { %2655 = vmatpush3.msra.mxu1 %v3333_v27  ;;  %v1583_v27 = vld [vmem:[%s3773_s7 + $0x38] sm:$0xff] }
 0xa20   :  { %2656 = vmatprep.subr.mxu1 %v2753_v3 }
 0xa21   :  { %2657 = vmatpush3.msra.mxu1 %v3340_v28  ;;  %v1582_v28 = vld [vmem:[%s3773_s7 + $0x30] sm:$0xff] }
 0xa22   :  { %2658 = vmatprep.subr.mxu1 %v2753_v3 }
 0xa23   :  { %2659 = vmatpush3.msra.mxu1 %v3347_v29  ;;  %v1581_v29 = vld [vmem:[%s3773_s7 + $0x28] sm:$0xff] }
 0xa24   :  { %2660 = vmatprep.subr.mxu1 %v2753_v3 }
 0xa25   :  { %2661 = vmatpush3.msra.mxu1 %v3354_v30  ;;  %v1580_v30 = vld [vmem:[%s3773_s7 + $0x20] sm:$0xff] }
 0xa26   :  { %2662 = vmatprep.subr.mxu1 %v2753_v3 }
 0xa27   :  { %2663 = vmatpush3.msra.mxu1 %v3361_v31  ;;  %v1579_v31 = vld [vmem:[%s3773_s7 + $0x18] sm:$0xff] }
 0xa28   :  { %2664 = vmatprep.subr.mxu1 %v2753_v3 }
 0xa29   :  { %2665 = vmatpush3.msra.mxu1 %v3368_v32  ;;  %v1578_v32 = vld [vmem:[%s3773_s7 + $0x10] sm:$0xff] }
 0xa2a   :  { %2666 = vmatprep.subr.mxu1 %v2753_v3 }
 0xa2b   :  { %2667 = vmatpush3.msra.mxu1 %v3375_v33  ;;  %v1577_v33 = vld [vmem:[%s3773_s7 + $0x8] sm:$0xff] }
 0xa2c   :  { %2668 = vmatprep.subr.mxu1 %v2753_v3 }
 0xa2d   :  { %2669 = vmatpush3.msra.mxu1 %v3382_v34  ;;  %v1576_v34 = vld [vmem:[%s3773_s7] sm:$0xff] }
 0xa2e   :  { %2670 = vmatprep.subr.mxu1 %v2753_v3  ;;  %v1589_v3 = vld [vmem:[%s3773_s7 + $0x68] sm:$0xff] }
 0xa2f   :  { %2671 = vmatpush3.msra.mxu1 %v3389_v35  ;;  %v957_v35 = vadd.f32 %v3470_v47, %v3518_v57 }
 0xad0   :  { %v1412_v17 = vpop.f32.mrf.mxu1 }
 0xad1   :  { %v1416_v18 = vadd.f32 %v1412_v17, %v952_v16 }
 0xad2   :  { %v2604_v19 = vpop.f32.mrf.mxu1 }
 0xad3   :  { %2747 = vtanh.f32 %v1416_v18 }
 0xae0   :  { %v2748_v20 = vpop.eup %2747 }
 0xae1   :  { %2638 = vmatmul.mubr.f32.vlgmr.msra.gmra.mxu0 %v2748_v20 }
 0xae2   :  { %2676 = vmatpush3.msra.mxu0 %v1591_v15  ;;  %2707 = vmatprep.mubr.f32.mxu0 %v3473_v39 }
 0xae3   :  { %2677 = vmatprep.subr.mxu0 %v1590_v21 }
 0xae4   :  { %2678 = vmatpush3.msra.mxu0 %v1590_v21 }
 0xae5   :  { %2679 = vmatprep.subr.mxu0 %v1589_v3 }
 0xae6   :  { %2680 = vmatpush3.msra.mxu0 %v1589_v3 }
 0xae7   :  { %2681 = vmatprep.subr.mxu0 %v1588_v22 }
 0xae8   :  { %2682 = vmatpush3.msra.mxu0 %v1588_v22 }
 0xae9   :  { %2683 = vmatprep.subr.mxu0 %v1587_v23 }
 0xaea   :  { %2684 = vmatpush3.msra.mxu0 %v1587_v23 }
 0xaeb   :  { %2685 = vmatprep.subr.mxu0 %v1586_v24 }
 0xaec   :  { %2686 = vmatpush3.msra.mxu0 %v1586_v24 }
 0xaed   :  { %2687 = vmatprep.subr.mxu0 %v1585_v25 }
 0xaee   :  { %2688 = vmatpush3.msra.mxu0 %v1585_v25 }
 0xaef   :  { %2689 = vmatprep.subr.mxu0 %v1584_v26 }
 0xaf0   :  { %2690 = vmatpush3.msra.mxu0 %v1584_v26 }
 0xaf1   :  { %2691 = vmatprep.subr.mxu0 %v1583_v27 }
 0xaf2   :  { %2692 = vmatpush3.msra.mxu0 %v1583_v27 }
 0xaf3   :  { %2693 = vmatprep.subr.mxu0 %v1582_v28 }
 0xaf4   :  { %2694 = vmatpush3.msra.mxu0 %v1582_v28 }
 0xaf5   :  { %2695 = vmatprep.subr.mxu0 %v1581_v29 }
 0xaf6   :  { %2696 = vmatpush3.msra.mxu0 %v1581_v29 }
 0xaf7   :  { %2697 = vmatprep.subr.mxu0 %v1580_v30 }
 0xaf8   :  { %2698 = vmatpush3.msra.mxu0 %v1580_v30 }
 0xaf9   :  { %2699 = vmatprep.subr.mxu0 %v1579_v31 }
 0xafa   :  { %2700 = vmatpush3.msra.mxu0 %v1579_v31 }
 0xafb   :  { %2701 = vmatprep.subr.mxu0 %v1578_v32 }
 0xafc   :  { %2702 = vmatpush3.msra.mxu0 %v1578_v32 }
 0xafd   :  { %2703 = vmatprep.subr.mxu0 %v1577_v33 }
 0xafe   :  { %2704 = vmatpush3.msra.mxu0 %v1577_v33 }
 0xaff   :  { %2705 = vmatprep.subr.mxu0 %v1576_v34 }
 0xb00   :  { %2706 = vmatpush3.msra.mxu0 %v1576_v34 }
 0xb01   :  { %2708 = vmatmul.mubr.f32.vlgmr.msra.gmra.mxu0 %v3521_v62 }
 0xb02   :  { %2710 = vmatprep.mubr.f32.mxu0 %v3559_v4 }
 0xb05   :  { %2711 = vmatmul.mubr.f32.gmra.mxu0 %v3598_v9 }
 0xb06   :  { %2713 = vmatprep.mubr.f32.mxu0 %v3636_v14 }
 0xb09   :  { %2714 = vmatmul.mubr.f32.gmra.mxu0 %v2748_v20 }
 0xba1   :  { %v1486_v36 = vpop.f32.mrf.mxu0 }
 0xba2   :  { %v1490_v37 = vadd.f32 %v1486_v36, %v957_v35 }
 0xba3   :  { %v2639_v38 = vpop.f32.mrf.mxu0 }
 0xba4   :  { %2749 = vtanh.f32 %v1490_v37 }
 0xbb1   :  { %v2750_v40 = vpop.eup %2749 }
 0xbb2   :  { %2673 = vmatmul.mubr.f32.vlgmr.msra.gmra.mxu1 %v2750_v40  ;;  %2716 = vmatprep.mubr.f32.mxu0 %v2750_v40 }
 0xbc1   :  { %v2709_v42 = vpop.f32.mrf.mxu0 }
 0xbc2   :  { %v1671_v43 = vadd.f32 %v2709_v42, %v1727_v41 }
 0xbc3   :  { %v1665_v44 = vpop.f32.mrf.mxu0 }
 0xbc4   :  { %1705 = vst.msk [vmem:[%s3775_s9 + $0x8] sm:$0xff] %vm70_vm1, %v1671_v43  ;;  %v1666_v45 = vadd.f32 %v1727_v41, %v1665_v44 }
 0xbc5   :  { %v2712_v46 = vpop.f32.mrf.mxu0 }
 0xbc6   :  { %1704 = vst.msk [vmem:[%s3775_s9] sm:$0xff] %vm70_vm1, %v1666_v45  ;;  %v1681_v48 = vadd.f32 %v2712_v46, %v1727_v41 }
 0xbc7   :  { %v1675_v49 = vpop.f32.mrf.mxu0 }
 0xbc8   :  { %1707 = vst.msk [vmem:[%s3775_s9 + $0x18] sm:$0xff] %vm70_vm1, %v1681_v48  ;;  %v1676_v50 = vadd.f32 %v1727_v41, %v1675_v49 }
 0xbc9   :  { %v2715_v51 = vpop.f32.mrf.mxu0 }
 0xbca   :  { %1706 = vst.msk [vmem:[%s3775_s9 + $0x10] sm:$0xff] %vm70_vm1, %v1676_v50  ;;  %v1691_v39 = vadd.f32 %v2715_v51, %v1727_v41 }
 0xbcb   :  { %v1685_v52 = vpop.f32.mrf.mxu0 }
 0xbcc   :  { %1709 = vst.msk [vmem:[%s3775_s9 + $0x28] sm:$0xff] %vm70_vm1, %v1691_v39  ;;  %v1686_v53 = vadd.f32 %v1727_v41, %v1685_v52 }
 0xbce   :  { %1708 = vst.msk [vmem:[%s3775_s9 + $0x20] sm:$0xff] %vm70_vm1, %v1686_v53 }
 0xc72   :  { %v1560_v55 = vpop.f32.mrf.mxu1 }
 0xc73   :  { %v1564_v57 = vadd.f32 %v1560_v55, %v962_v54 }
 0xc74   :  { %v2674_v58 = vpop.f32.mrf.mxu1 }
 0xc75   :  { %2751 = vtanh.f32 %v1564_v57 }
 0xc82   :  { %v2752_v59 = vpop.eup %2751 }
 0xc83   :  { %2717 = vmatmul.mubr.f32.gmra.mxu0 %v2752_v59 }
 0xd43   :  { %v2718_v60 = vpop.f32.mrf.mxu0 }
 0xd44   :  { %v1701_v61 = vadd.f32 %v2718_v60, %v1727_v41 }
 0xd45   :  { %v1695_v62 = vpop.f32.mrf.mxu0 }
 0xd46   :  { %1711 = vst.msk [vmem:[%s3775_s9 + $0x38] sm:$0xff] %vm70_vm1, %v1701_v61  ;;  %v1696_v63 = vadd.f32 %v1727_v41, %v1695_v62 }
 0xd48   :  { %1710 = vst.msk [vmem:[%s3775_s9 + $0x30] sm:$0xff] %vm70_vm1, %v1696_v63 }

</bundles_post_ra>
